<compile_context>
chip_gen: v7x
topology: tpu7x:2x2x1
jax: 0.10.0
libtpu: 0.0.40
codegen_flags: <defaults>
</compile_context>

<pallas_src>
import math

import jax
import jax.numpy as jnp
import numpy as np
from jax.experimental import pallas as pl
from jax.experimental.pallas import tpu as pltpu

KH = KW = 3
STRIDE = 2


def _round_up(a, m):
    return -(-a // m) * m


def _vmem_capacity_bytes():
    try:
        info = pltpu.get_tpu_info()
        cap = getattr(info, "vmem_capacity_bytes", None)
        if cap:
            return int(cap)
    except Exception:
        pass
    return 64 * 1024 * 1024          # conservative: v7x per-TensorCore VMEM


def _cout_tile(cout):
    if cout > 256 and cout % 256 == 0:
        return 256
    if cout > 256 and cout % 128 == 0:
        return 128
    return cout


def _conv_row_tile(ho, wpk, c, tco, n_parallel_other, in_isz, out_isz, budget):
    """Largest row-pair tile whose double-buffered blocks + temps fit the budget."""
    c2 = 2 * c
    fixed = 2 * (c2 * 8 * tco * in_isz + 4 * tco      # WE+WO+WH (+bias), dbl-buffered
                 + wpk * c2 * in_isz)                  # halo row, dbl-buffered
    per_row = (2 * 2 * wpk * c2 * in_isz               # E + O blocks, dbl-buffered
               + 2 * wpk * tco * out_isz               # output block, dbl-buffered
               + 16 * wpk * tco * 4)                   # f32 in-kernel temporaries
    t = (budget - fixed) // per_row
    t = max(1, min(int(t), ho, 256))
    if n_parallel_other == 1 and ho >= 2:              # >=2 grid steps (v7x megacore)
        t = min(t, -(-ho // 2))
    return t


def _downsample_conv_kernel(xe_ref, xo_ref, xh_ref, we_ref, wo_ref, wh_ref,
                            b_ref, o_ref):
    # xe_ref : (1, tHo, 1, Wpk, 2C)  even padded rows 2*oh          (kh = 0 taps)
    # xo_ref : (1, tHo, 1, Wpk, 2C)  odd  padded rows 2*oh + 1      (kh = 1 taps)
    # xh_ref : (1, 1, 1, Wpk, 2C)    halo: padded row 2*(r0 + tHo)  (kh = 2, last row)
    # we_ref : (1, 2C, 4*tCo)  chunks [kh0/kw01 | kh0/kw2 | kh2/kw01 | kh2/kw2]
    # wo_ref : (1, 2C, 2*tCo)  chunks [kh1/kw01 | kh1/kw2]
    # wh_ref : (1, 2C, 2*tCo)  chunks [kh2/kw01 | kh2/kw2]
    # b_ref  : (1, tCo)
    # o_ref  : (1, tHo, Wpk, tCo)   packed columns >= Wo are cropped by the caller
    _, tHo, Wpk, tCo = o_ref.shape
    C2 = xe_ref.shape[-1]
    M = tHo * Wpk

    xe = xe_ref[...].reshape(M, C2)
    xo = xo_ref[...].reshape(M, C2)
    xh = xh_ref[...].reshape(Wpk, C2)

    re = jnp.dot(xe, we_ref[0], preferred_element_type=jnp.float32)   # (M, 4*tCo)
    ro = jnp.dot(xo, wo_ref[0], preferred_element_type=jnp.float32)   # (M, 2*tCo)
    rh = jnp.dot(xh, wh_ref[0], preferred_element_type=jnp.float32)   # (Wpk, 2*tCo)

    e_a0 = re[:, 0 * tCo:1 * tCo]      # kh=0, kw=0/1 -> no shift
    e_b0 = re[:, 1 * tCo:2 * tCo]      # kh=0, kw=2   -> next packed column
    e_a2 = re[:, 2 * tCo:3 * tCo]      # kh=2, kw=0/1 -> next row pair
    e_b2 = re[:, 3 * tCo:4 * tCo]      # kh=2, kw=2   -> next row pair + column
    o_a1 = ro[:, :tCo]                 # kh=1, kw=0/1
    o_b1 = ro[:, tCo:]                 # kh=1, kw=2   -> next packed column
    h_a2 = rh[:, :tCo]
    h_b2 = rh[:, tCo:]

    def shift_col(x):
        # y[m] = x[m + 1]; the wrapped/zero rows only ever feed cropped columns.
        return jnp.concatenate([x[1:], jnp.zeros_like(x[:1])], axis=0)

    top = e_a0 + o_a1 + shift_col(e_b0 + o_b1)
    f_all = (jnp.concatenate([e_a2, h_a2], axis=0)
             + shift_col(jnp.concatenate([e_b2, h_b2], axis=0)))
    acc = top + f_all[Wpk:] + b_ref[...].astype(jnp.float32)
    o_ref[0] = acc.reshape(tHo, Wpk, tCo).astype(o_ref.dtype)


def _downsample_pool_kernel(xe_ref, xo_ref, o_ref):
    # xe_ref/xo_ref: (1, tHo, 1, Wo, 2C) even / odd rows, column pairs packed in lanes.
    # o_ref        : (1, tHo, Wo, C)
    # TODO(synk): for C < 128 the output lane width is sub-vreg (masked stores);
    # a lane-repack would help but the op is tiny for those shapes.
    _, tHo, Wo, C = o_ref.shape
    s = xe_ref[...].astype(jnp.float32) + xo_ref[...].astype(jnp.float32)
    s = s[..., :C] + s[..., C:]                       # column-pair sum
    o_ref[...] = (s * 0.25).reshape(1, tHo, Wo, C).astype(o_ref.dtype)


def downsample(x_nchw, w_oihw=None, b=None, use_conv=True, *,
               matmul_dtype=None, row_tile=None):
    """Forward of Downsample: Conv2d(C,C,3,stride=2,pad=1) or AvgPool2d(2); NCHW io."""
    N, C, H, W = x_nchw.shape
    x = jnp.transpose(x_nchw, (0, 2, 3, 1))            # NCHW -> NHWC (lane = C)

    vmem_cap = _vmem_capacity_bytes()
    vmem_avail = max(vmem_cap - 16 * 1024 * 1024, 8 * 1024 * 1024)
    budget = (vmem_avail * 6) // 10

    if use_conv:
        assert w_oihw is not None and b is not None
        Cout = int(w_oihw.shape[0])
        assert w_oihw.shape == (Cout, C, KH, KW) and Cout == C

        Ho = (H - 1) // 2 + 1
        Wo = (W - 1) // 2 + 1
        # Packed width: multiple of 8 (layout-free in-kernel reshapes) unless
        # that would waste more than ~25% of the work.
        wpk8 = _round_up(Wo + 1, 8)
        Wpk = wpk8 if 4 * wpk8 <= 5 * (Wo + 1) else Wo + 1

        if matmul_dtype is not None:
            x = x.astype(matmul_dtype)                  # halves HBM/VMEM traffic
        in_isz = jnp.dtype(x.dtype).itemsize
        out_isz = jnp.dtype(x_nchw.dtype).itemsize

        tCo = _cout_tile(Cout)
        n_co = Cout // tCo
        if row_tile is not None:
            tHo = int(row_tile)
        else:
            tHo = _conv_row_tile(Ho, Wpk, C, tCo, N * n_co, in_isz, out_isz, budget)
        Ho_pad = _round_up(Ho, tHo)

        # Zero pad so the padded rows pair into Ho_pad+1 row pairs and the padded
        # width packs into Wpk column pairs; the reshape is a free HBM repack.
        pad_b = 2 * Ho_pad + 1 - H
        pad_r = 2 * Wpk - 1 - W
        xp = jnp.pad(x, ((0, 0), (1, pad_b), (1, pad_r), (0, 0)))
        xr = xp.reshape(N, Ho_pad + 1, 2, Wpk, 2 * C)

        # Weights: HWIO; kw=0/1 taps stacked on Cin ("a"), kw=2 tap zero-padded to
        # 2C ("b", consumed from the next packed column via a result-side shift).
        w_hwio = jnp.transpose(w_oihw, (2, 3, 1, 0))
        if matmul_dtype is not None:
            w_hwio = w_hwio.astype(matmul_dtype)
        zpad = jnp.zeros((C, Cout), w_hwio.dtype)
        wa = [jnp.concatenate([w_hwio[kh, 0], w_hwio[kh, 1]], axis=0)
              for kh in range(KH)]                      # (2C, Cout)
        wb = [jnp.concatenate([w_hwio[kh, 2], zpad], axis=0)
              for kh in range(KH)]                      # (2C, Cout)

        def fuse(mats):
            # (k, 2C, Cout) -> (n_co, 2C, k*tCo): per Cout tile, the k chunks
            # concatenated along the matmul output dim.
            arr = jnp.stack(mats, axis=0).reshape(len(mats), 2 * C, n_co, tCo)
            return jnp.transpose(arr, (2, 1, 0, 3)).reshape(
                n_co, 2 * C, len(mats) * tCo)

        we = fuse([wa[0], wb[0], wa[2], wb[2]])
        wo = fuse([wa[1], wb[1]])
        wh = fuse([wa[2], wb[2]])
        b2 = b.reshape(1, Cout).astype(jnp.float32)

        grid = (N, Ho_pad // tHo, n_co)
        out_nhwc = pl.pallas_call(
            _downsample_conv_kernel,
            out_shape=jax.ShapeDtypeStruct((N, Ho_pad, Wpk, Cout), x_nchw.dtype),
            grid_spec=pltpu.PrefetchScalarGridSpec(
                num_scalar_prefetch=0,
                grid=grid,
                in_specs=[
                    pl.BlockSpec((1, tHo, 1, Wpk, 2 * C),
                                 lambda n, r, co: (n, r, 0, 0, 0)),    # even rows
                    pl.BlockSpec((1, tHo, 1, Wpk, 2 * C),
                                 lambda n, r, co: (n, r, 1, 0, 0)),    # odd rows
                    pl.BlockSpec((1, 1, 1, Wpk, 2 * C),
                                 lambda n, r, co: (n, (r + 1) * tHo, 0, 0, 0)),
                    pl.BlockSpec((1, 2 * C, 4 * tCo), lambda n, r, co: (co, 0, 0)),
                    pl.BlockSpec((1, 2 * C, 2 * tCo), lambda n, r, co: (co, 0, 0)),
                    pl.BlockSpec((1, 2 * C, 2 * tCo), lambda n, r, co: (co, 0, 0)),
                    pl.BlockSpec((1, tCo), lambda n, r, co: (0, co)),
                ],
                out_specs=pl.BlockSpec((1, tHo, Wpk, tCo),
                                       lambda n, r, co: (n, r, 0, co)),
            ),
            compiler_params=pltpu.CompilerParams(
                dimension_semantics=("parallel", "parallel", "parallel"),
                vmem_limit_bytes=int(vmem_avail)),
        )(xr, xr, xr, we, wo, wh, b2)
        # Crop the row/column padding while transposing back (fuses into one pass).
        return jnp.transpose(out_nhwc[:, :Ho, :Wo, :], (0, 3, 1, 2))

    # ---- AvgPool2d(2): floor semantics for odd H/W ----
    Ho, Wo = H // 2, W // 2
    xr = x[:, :2 * Ho, :2 * Wo, :].reshape(N, Ho, 2, Wo, 2 * C)
    isz = jnp.dtype(xr.dtype).itemsize
    per_row = 2 * 2 * Wo * 2 * C * isz + 2 * Wo * C * isz + 6 * Wo * C * 4
    cap = max(1, min(Ho, budget // per_row, 256))
    tHo = max(t for t in range(1, cap + 1) if Ho % t == 0)
    grid = (N, Ho // tHo)
    out_nhwc = pl.pallas_call(
        _downsample_pool_kernel,
        out_shape=jax.ShapeDtypeStruct((N, Ho, Wo, C), x_nchw.dtype),
        grid_spec=pltpu.PrefetchScalarGridSpec(
            num_scalar_prefetch=0,
            grid=grid,
            in_specs=[
                pl.BlockSpec((1, tHo, 1, Wo, 2 * C), lambda n, r: (n, r, 0, 0, 0)),
                pl.BlockSpec((1, tHo, 1, Wo, 2 * C), lambda n, r: (n, r, 1, 0, 0)),
            ],
            out_specs=pl.BlockSpec((1, tHo, Wo, C), lambda n, r: (n, r, 0, 0)),
        ),
        compiler_params=pltpu.CompilerParams(
            dimension_semantics=("parallel", "parallel"),
            vmem_limit_bytes=int(vmem_avail)),
    )(xr, xr)
    return jnp.transpose(out_nhwc, (0, 3, 1, 2))


if __name__ == "__main__":
    key = jax.random.PRNGKey(0)
    k1, k2, k3 = jax.random.split(key, 3)

    def conv_ref(x, w, b):
        return jax.lax.conv_general_dilated(
            x, w, window_strides=(STRIDE, STRIDE), padding=((1, 1), (1, 1)),
            dimension_numbers=("NCHW", "OIHW", "NCHW")) + b.reshape(1, -1, 1, 1)

    # --- primary shape: use_conv=True, f32 (exact PyTorch Conv2d semantics) ---
    N, C, H, W = 2, 4, 16, 16
    x = jax.random.normal(k1, (N, C, H, W), dtype=jnp.float32)
    bound = 1.0 / math.sqrt(C * KH * KW)
    w = jax.random.uniform(k2, (C, C, KH, KW), jnp.float32, -bound, bound)  # OIHW
    b = jax.random.uniform(k3, (C,), jnp.float32, -bound, bound)

    out_conv = jax.block_until_ready(downsample(x, w, b, use_conv=True))
    assert out_conv.shape == (N, C, H // 2, W // 2)
    np.testing.assert_allclose(np.asarray(out_conv), np.asarray(conv_ref(x, w, b)),
                               rtol=1e-4, atol=1e-4)

    # --- larger spatial shape: row tiling, halo block, 8-aligned packed width ---
    Nb, Cb, Hb, Wb = 1, 8, 40, 40
    xb = jax.random.normal(k1, (Nb, Cb, Hb, Wb), dtype=jnp.float32)
    bnd = 1.0 / math.sqrt(Cb * KH * KW)
    wb_ = jax.random.uniform(k2, (Cb, Cb, KH, KW), jnp.float32, -bnd, bnd)
    bb_ = jax.random.uniform(k3, (Cb,), jnp.float32, -bnd, bnd)
    out_b = jax.block_until_ready(
        downsample(xb, wb_, bb_, use_conv=True, row_tile=5))
    np.testing.assert_allclose(np.asarray(out_b), np.asarray(conv_ref(xb, wb_, bb_)),
                               rtol=1e-4, atol=1e-4)

    # --- odd H/W (PyTorch Conv2d stride-2 pad-1 semantics + Ho padding/crop) ---
    xo = jax.random.normal(k1, (1, 4, 9, 11), dtype=jnp.float32)
    out_o = jax.block_until_ready(downsample(xo, w, b, use_conv=True))
    np.testing.assert_allclose(np.asarray(out_o), np.asarray(conv_ref(xo, w, b)),
                               rtol=1e-4, atol=1e-4)

    # --- bf16 MXU operands (f32 accumulation), loose tolerance ---
    out_bf16 = jax.block_until_ready(
        downsample(x, w, b, use_conv=True, matmul_dtype=jnp.bfloat16))
    np.testing.assert_allclose(np.asarray(out_bf16), np.asarray(conv_ref(x, w, b)),
                               rtol=5e-2, atol=1e-1)

    # --- use_conv=False path (AvgPool2d(2)) ---
    out_pool = jax.block_until_ready(downsample(x, use_conv=False))
    ref_pool = x.reshape(N, C, H // 2, 2, W // 2, 2).mean(axis=(3, 5))
    np.testing.assert_allclose(np.asarray(out_pool), np.asarray(ref_pool),
                               rtol=1e-5, atol=1e-5)

    print("KERNEL_OK")
</pallas_src>

<mosaic_0001>
module attributes {stable_mosaic.version = 11 : i64} {
  func.func @_downsample_conv_kernel(%arg0: i32, %arg1: i32, %arg2: i32, %arg3: memref<1x8x1x9x8xf32, #tpu.memory_space<vmem>>, %arg4: memref<1x8x1x9x8xf32, #tpu.memory_space<vmem>>, %arg5: memref<1x1x1x9x8xf32, #tpu.memory_space<vmem>>, %arg6: memref<1x8x16xf32, #tpu.memory_space<vmem>>, %arg7: memref<1x8x8xf32, #tpu.memory_space<vmem>>, %arg8: memref<1x8x8xf32, #tpu.memory_space<vmem>>, %arg9: memref<1x4xf32, #tpu.memory_space<vmem>>, %arg10: memref<1x8x9x4xf32, #tpu.memory_space<vmem>>) attributes {dimension_semantics = [#tpu.dimension_semantics<parallel>, #tpu.dimension_semantics<parallel>, #tpu.dimension_semantics<parallel>], iteration_bounds = array<i64: 2, 1, 1>, scalar_prefetch = 0 : i64, scratch_operands = 0 : i64, tpu.core_type = #tpu.core_type<tc>, window_params = [{transform_indices = @transform_0, window_bounds = array<i64: 1, 8, 1, 9, 8>}, {transform_indices = @transform_1, window_bounds = array<i64: 1, 8, 1, 9, 8>}, {transform_indices = @transform_2, window_bounds = array<i64: 1, 1, 1, 9, 8>}, {transform_indices = @transform_3, window_bounds = array<i64: 1, 8, 16>}, {transform_indices = @transform_4, window_bounds = array<i64: 1, 8, 8>}, {transform_indices = @transform_5, window_bounds = array<i64: 1, 8, 8>}, {transform_indices = @transform_6, window_bounds = array<i64: 1, 4>}, {transform_indices = @transform_7, window_bounds = array<i64: 1, 8, 9, 4>}]} {
    %c0 = arith.constant 0 : index
    %c0_0 = arith.constant 0 : index
    %c0_1 = arith.constant 0 : index
    %c0_2 = arith.constant 0 : index
    %c0_3 = arith.constant 0 : index
    %0 = vector.load %arg3[%c0, %c0_0, %c0_1, %c0_2, %c0_3] : memref<1x8x1x9x8xf32, #tpu.memory_space<vmem>>, vector<1x8x1x9x8xf32>
    %1 = vector.shape_cast %0 : vector<1x8x1x9x8xf32> to vector<72x8xf32>
    %c0_4 = arith.constant 0 : index
    %c0_5 = arith.constant 0 : index
    %c0_6 = arith.constant 0 : index
    %c0_7 = arith.constant 0 : index
    %c0_8 = arith.constant 0 : index
    %2 = vector.load %arg4[%c0_4, %c0_5, %c0_6, %c0_7, %c0_8] : memref<1x8x1x9x8xf32, #tpu.memory_space<vmem>>, vector<1x8x1x9x8xf32>
    %3 = vector.shape_cast %2 : vector<1x8x1x9x8xf32> to vector<72x8xf32>
    %c0_9 = arith.constant 0 : index
    %c0_10 = arith.constant 0 : index
    %c0_11 = arith.constant 0 : index
    %c0_12 = arith.constant 0 : index
    %c0_13 = arith.constant 0 : index
    %4 = vector.load %arg5[%c0_9, %c0_10, %c0_11, %c0_12, %c0_13] : memref<1x1x1x9x8xf32, #tpu.memory_space<vmem>>, vector<1x1x1x9x8xf32>
    %5 = vector.shape_cast %4 : vector<1x1x1x9x8xf32> to vector<9x8xf32>
    %c0_14 = arith.constant 0 : index
    %c0_15 = arith.constant 0 : index
    %c0_16 = arith.constant 0 : index
    %6 = vector.load %arg6[%c0_14, %c0_15, %c0_16] : memref<1x8x16xf32, #tpu.memory_space<vmem>>, vector<1x8x16xf32>
    %7 = vector.shape_cast %6 : vector<1x8x16xf32> to vector<8x16xf32>
    %cst = arith.constant dense<0.000000e+00> : vector<72x16xf32>
    %8 = tpu.matmul %1, %7, %cst {dimension_numbers = #tpu.dot_dimension_numbers<[1], [0], [0], [1], [0, 0, 1, 1], [], []>} : vector<72x8xf32>, vector<8x16xf32>, vector<72x16xf32> -> vector<72x16xf32>
    %c0_17 = arith.constant 0 : index
    %c0_18 = arith.constant 0 : index
    %c0_19 = arith.constant 0 : index
    %9 = vector.load %arg7[%c0_17, %c0_18, %c0_19] : memref<1x8x8xf32, #tpu.memory_space<vmem>>, vector<1x8x8xf32>
    %10 = vector.shape_cast %9 : vector<1x8x8xf32> to vector<8x8xf32>
    %cst_20 = arith.constant dense<0.000000e+00> : vector<72x8xf32>
    %11 = tpu.matmul %3, %10, %cst_20 {dimension_numbers = #tpu.dot_dimension_numbers<[1], [0], [0], [1], [0, 0, 1, 1], [], []>} : vector<72x8xf32>, vector<8x8xf32>, vector<72x8xf32> -> vector<72x8xf32>
    %c0_21 = arith.constant 0 : index
    %c0_22 = arith.constant 0 : index
    %c0_23 = arith.constant 0 : index
    %12 = vector.load %arg8[%c0_21, %c0_22, %c0_23] : memref<1x8x8xf32, #tpu.memory_space<vmem>>, vector<1x8x8xf32>
    %13 = vector.shape_cast %12 : vector<1x8x8xf32> to vector<8x8xf32>
    %cst_24 = arith.constant dense<0.000000e+00> : vector<9x8xf32>
    %14 = tpu.matmul %5, %13, %cst_24 {dimension_numbers = #tpu.dot_dimension_numbers<[1], [0], [0], [1], [0, 0, 1, 1], [], []>} : vector<9x8xf32>, vector<8x8xf32>, vector<9x8xf32> -> vector<9x8xf32>
    %15 = vector.extract_strided_slice %8 {offsets = [0, 0], sizes = [72, 4], strides = [1, 1]} : vector<72x16xf32> to vector<72x4xf32>
    %16 = vector.extract_strided_slice %8 {offsets = [0, 4], sizes = [72, 4], strides = [1, 1]} : vector<72x16xf32> to vector<72x4xf32>
    %17 = vector.extract_strided_slice %8 {offsets = [0, 8], sizes = [72, 4], strides = [1, 1]} : vector<72x16xf32> to vector<72x4xf32>
    %18 = vector.extract_strided_slice %8 {offsets = [0, 12], sizes = [72, 4], strides = [1, 1]} : vector<72x16xf32> to vector<72x4xf32>
    %19 = vector.extract_strided_slice %11 {offsets = [0, 0], sizes = [72, 4], strides = [1, 1]} : vector<72x8xf32> to vector<72x4xf32>
    %20 = vector.extract_strided_slice %11 {offsets = [0, 4], sizes = [72, 4], strides = [1, 1]} : vector<72x8xf32> to vector<72x4xf32>
    %21 = vector.extract_strided_slice %14 {offsets = [0, 0], sizes = [9, 4], strides = [1, 1]} : vector<9x8xf32> to vector<9x4xf32>
    %22 = vector.extract_strided_slice %14 {offsets = [0, 4], sizes = [9, 4], strides = [1, 1]} : vector<9x8xf32> to vector<9x4xf32>
    %23 = arith.addf %15, %19 : vector<72x4xf32>
    %24 = arith.addf %16, %20 : vector<72x4xf32>
    %25 = vector.extract_strided_slice %24 {offsets = [1, 0], sizes = [71, 4], strides = [1, 1]} : vector<72x4xf32> to vector<71x4xf32>
    %cst_25 = arith.constant 0.000000e+00 : f32
    %26 = vector.broadcast %cst_25 : f32 to vector<1x4xf32>
    %27 = tpu.concatenate %25, %26 in 0 : vector<71x4xf32>, vector<1x4xf32> -> vector<72x4xf32>
    %28 = arith.addf %23, %27 : vector<72x4xf32>
    %29 = tpu.concatenate %17, %21 in 0 : vector<72x4xf32>, vector<9x4xf32> -> vector<81x4xf32>
    %30 = tpu.concatenate %18, %22 in 0 : vector<72x4xf32>, vector<9x4xf32> -> vector<81x4xf32>
    %31 = vector.extract_strided_slice %30 {offsets = [1, 0], sizes = [80, 4], strides = [1, 1]} : vector<81x4xf32> to vector<80x4xf32>
    %cst_26 = arith.constant 0.000000e+00 : f32
    %32 = vector.broadcast %cst_26 : f32 to vector<1x4xf32>
    %33 = tpu.concatenate %31, %32 in 0 : vector<80x4xf32>, vector<1x4xf32> -> vector<81x4xf32>
    %34 = arith.addf %29, %33 : vector<81x4xf32>
    %35 = vector.extract_strided_slice %34 {offsets = [9, 0], sizes = [72, 4], strides = [1, 1]} : vector<81x4xf32> to vector<72x4xf32>
    %36 = arith.addf %28, %35 : vector<72x4xf32>
    %c0_27 = arith.constant 0 : index
    %c0_28 = arith.constant 0 : index
    %37 = vector.load %arg9[%c0_27, %c0_28] : memref<1x4xf32, #tpu.memory_space<vmem>>, vector<1x4xf32>
    %38 = vector.broadcast %37 : vector<1x4xf32> to vector<72x4xf32>
    %39 = arith.addf %36, %38 : vector<72x4xf32>
    %40 = vector.shape_cast %39 : vector<72x4xf32> to vector<8x9x4xf32>
    %c0_29 = arith.constant 0 : index
    %c0_30 = arith.constant 0 : index
    %c0_31 = arith.constant 0 : index
    %c0_32 = arith.constant 0 : index
    %41 = vector.load %arg10[%c0_29, %c0_30, %c0_31, %c0_32] : memref<1x8x9x4xf32, #tpu.memory_space<vmem>>, vector<1x8x9x4xf32>
    %42 = vector.shape_cast %41 : vector<1x8x9x4xf32> to vector<8x9x4xf32>
    %43 = vector.shape_cast %40 : vector<8x9x4xf32> to vector<1x8x9x4xf32>
    tpu.vector_store %arg10[%c0_29, %c0_30, %c0_31, %c0_32], %43 {strides = array<i32>} : memref<1x8x9x4xf32, #tpu.memory_space<vmem>>, vector<1x8x9x4xf32>,
    return
  }
  func.func @transform_0(%arg0: i32, %arg1: i32, %arg2: i32) -> (i32, i32, i32, i32, i32) {
    %c0_i32 = arith.constant 0 : i32
    %c0_i32_0 = arith.constant 0 : i32
    %c0_i32_1 = arith.constant 0 : i32
    %c0_i32_2 = arith.constant 0 : i32
    return %arg0, %arg1, %c0_i32, %c0_i32_0, %c0_i32_1 : i32, i32, i32, i32, i32
  }
  func.func @transform_1(%arg0: i32, %arg1: i32, %arg2: i32) -> (i32, i32, i32, i32, i32) {
    %c1_i32 = arith.constant 1 : i32
    %c0_i32 = arith.constant 0 : i32
    %c0_i32_0 = arith.constant 0 : i32
    %c0_i32_1 = arith.constant 0 : i32
    return %arg0, %arg1, %c1_i32, %c0_i32, %c0_i32_0 : i32, i32, i32, i32, i32
  }
  func.func @transform_2(%arg0: i32, %arg1: i32, %arg2: i32) -> (i32, i32, i32, i32, i32) {
    %c1_i32 = arith.constant 1 : i32
    %0 = arith.addi %arg1, %c1_i32 : i32
    %c8_i32 = arith.constant 8 : i32
    %1 = arith.muli %0, %c8_i32 : i32
    %c0_i32 = arith.constant 0 : i32
    %c0_i32_0 = arith.constant 0 : i32
    %c0_i32_1 = arith.constant 0 : i32
    %c0_i32_2 = arith.constant 0 : i32
    return %arg0, %1, %c0_i32, %c0_i32_0, %c0_i32_1 : i32, i32, i32, i32, i32
  }
  func.func @transform_3(%arg0: i32, %arg1: i32, %arg2: i32) -> (i32, i32, i32) {
    %c0_i32 = arith.constant 0 : i32
    %c0_i32_0 = arith.constant 0 : i32
    %c0_i32_1 = arith.constant 0 : i32
    return %arg2, %c0_i32, %c0_i32_0 : i32, i32, i32
  }
  func.func @transform_4(%arg0: i32, %arg1: i32, %arg2: i32) -> (i32, i32, i32) {
    %c0_i32 = arith.constant 0 : i32
    %c0_i32_0 = arith.constant 0 : i32
    %c0_i32_1 = arith.constant 0 : i32
    return %arg2, %c0_i32, %c0_i32_0 : i32, i32, i32
  }
  func.func @transform_5(%arg0: i32, %arg1: i32, %arg2: i32) -> (i32, i32, i32) {
    %c0_i32 = arith.constant 0 : i32
    %c0_i32_0 = arith.constant 0 : i32
    %c0_i32_1 = arith.constant 0 : i32
    return %arg2, %c0_i32, %c0_i32_0 : i32, i32, i32
  }
  func.func @transform_6(%arg0: i32, %arg1: i32, %arg2: i32) -> (i32, i32) {
    %c0_i32 = arith.constant 0 : i32
    %c0_i32_0 = arith.constant 0 : i32
    return %c0_i32, %arg2 : i32, i32
  }
  func.func @transform_7(%arg0: i32, %arg1: i32, %arg2: i32) -> (i32, i32, i32, i32) {
    %c0_i32 = arith.constant 0 : i32
    %c0_i32_0 = arith.constant 0 : i32
    return %arg0, %arg1, %c0_i32, %arg2 : i32, i32, i32, i32
  }
}

</mosaic_0001>

<bundles_post_ra>
// kernel: tpu_custom_call.1
= control target key start
LH: loop header
LB: loop body
LE: loop exit
PB: predicated region body
PF: predicated region fallthrough
CT: control target
= control target key end

     0   :  { %s5099_s24 = smov 0   ;;  %s5101_s25 = smov 0   ;;  %s6023_s0 = inlined_call_operand.vmem [shape: f32[2,9,2,9,8], index: 0, kind: input, shape index: {}]   ;;  %s6024_s1 = inlined_call_operand.vmem [shape: f32[2,9,2,9,8], index: 1, kind: input, shape index: {}]   ;;  %s6025_s2 = inlined_call_operand.vmem [shape: f32[2,9,2,9,8], index: 2, kind: input, shape index: {}]   ;;  %s6026_s3 = inlined_call_operand.vmem [shape: f32[1,8,16], index: 3, kind: input, shape index: {}]   ;;  %s6027_s4 = inlined_call_operand.vmem [shape: f32[1,8,8], index: 4, kind: input, shape index: {}]   ;;  %s6028_s5 = inlined_call_operand.vmem [shape: f32[1,8,8], index: 5, kind: input, shape index: {}]   ;;  %s6029_s6 = inlined_call_operand.vmem [shape: f32[1,4], index: 6, kind: input, shape index: {}]   ;;  %s6030_s7 = inlined_call_operand.vmem [shape: f32[2,8,9,4], index: 7, kind: output, shape index: {}]  }
   0x1   :  { %s5103_s26 = smov 0   ;;  %s5105_s27 = smov 0  }
   0x2   :  { %s5107_s28 = smov 0  }
   0x3 LB: > { %s36_s29 = sadd.s32 1, %s5035_s27  ;;  %p52_p1 = scmp.ne.s32.totalorder %s5027_s25, %s5023_s24  ;;  %s5039_s28 = sphi %s5107_s28, %s17_s28   ;;  %s5035_s27 = sphi %s5105_s27, %s6037_s27   ;;  %s5031_s26 = sphi %s5103_s26, %s6036_s26   ;;  %s5027_s25 = sphi %s5101_s25, %s6035_s25   ;;  %s5023_s24 = sphi %s5099_s24, %s6034_s24  }
   0x4   : > { %p38_p0 = scmp.ge.s32.totalorder %s36_s29, 2  ;;  %p53_p2 = scmp.eq.s32.totalorder %s5039_s28, 0 }
   0x5   : > { %s45_s9 = sadd.s32 1, %s5027_s25  ;;  %p4658_p5 = scmp.ge.s32.totalorder %s5039_s28, 2 }
   0x6   : > { %s6039_s29 = smov (%p38_p0, %s36_s29), 0  ;;  %p5130_p3 = por %p53_p2, %p52_p1 }
   0x7   : > { %s40_s8 = ssub.s32 %s5035_s27, %s6039_s29  ;;  %299 = sbr.rel (%p4658_p5) target bundleno = 48 (0x30), region = 32 }
   0x8   : > { %p43_p4 = scmp.eq.s32.totalorder %s40_s8, 0 }
   0xa   : > { %s5138_s10 = scalar_select %p43_p4, %s5027_s25, %s45_s9  }
   0xe   : > { %302 = sbr.rel (!%p5130_p3) target bundleno = 31 (0x1f), region = 36  ;;  %s304_s11 = sand.u32 (%p5130_p3), 1, %s5027_s25  }
   0xf   : > { %s4840_s12 = smul.u32 (%p5130_p3), 288, %s5035_s27  ;;  %s4659_s13 = sshll.u32 (%p5130_p3), %s304_s11, 7 }
  0x10   : > { %s5150_s17 = scalar_lea.vmem (%p5130_p3), [#allocation2], %s4659_s13   ;;  %s5152_s18 = smov (%p5130_p3), 0  }
  0x11   : > { %s5148_s16 = scalar_lea.vmem (%p5130_p3), %s6023_s0, %s4840_s12  }
  0x15 LB: >> { %v415_v0 = vld [vmem:[%s5148_s16] sm:$0xff]  ;;  %v431_v8 = vld [vmem:[%s5148_s16 + $0x8] sm:$0xff]  ;;  %s409_s18 = sadd.s32 1, %s5043_s18   ;;  %s5043_s18 = sphi %s5152_s18, %s409_s18  }
  0x16   : >> { %v417_v1 = vld [vmem:[%s5148_s16 + $0x20] sm:$0xff]  ;;  %416 = vst [vmem:[%s5150_s17] sm:$0xff] %v415_v0  ;;  %432 = vst [vmem:[%s5150_s17 + $0x8] sm:$0xff] %v431_v8  ;;  %v433_v9 = vld [vmem:[%s5148_s16 + $0x28] sm:$0xff]  ;;  %p408_p6 = scmp.ge.s32.totalorder %s409_s18, 1 }
  0x17   : >> { %v419_v2 = vld [vmem:[%s5148_s16 + $0x40] sm:$0xff]  ;;  %418 = vst [vmem:[%s5150_s17 + $0x10] sm:$0xff] %v417_v1  ;;  %v435_v10 = vld [vmem:[%s5148_s16 + $0x48] sm:$0xff]  ;;  %434 = vst [vmem:[%s5150_s17 + $0x18] sm:$0xff] %v433_v9 }
  0x18   : >> { %420 = vst [vmem:[%s5150_s17 + $0x20] sm:$0xff] %v419_v2  ;;  %v421_v3 = vld [vmem:[%s5148_s16 + $0x60] sm:$0xff]  ;;  %v437_v11 = vld [vmem:[%s5148_s16 + $0x68] sm:$0xff]  ;;  %436 = vst [vmem:[%s5150_s17 + $0x28] sm:$0xff] %v435_v10  ;;  %411 = sbr.rel (!%p408_p6) target bundleno = 21 (0x15), region = 226 }
  0x19   : >> { %v423_v4 = vld [vmem:[%s5148_s16 + $0x80] sm:$0xff]  ;;  %422 = vst [vmem:[%s5150_s17 + $0x30] sm:$0xff] %v421_v3  ;;  %438 = vst [vmem:[%s5150_s17 + $0x38] sm:$0xff] %v437_v11  ;;  %v439_v12 = vld [vmem:[%s5148_s16 + $0x88] sm:$0xff] }
  0x1a   : >> { %v425_v5 = vld [vmem:[%s5148_s16 + $0xa0] sm:$0xff]  ;;  %424 = vst [vmem:[%s5150_s17 + $0x40] sm:$0xff] %v423_v4  ;;  %v441_v13 = vld [vmem:[%s5148_s16 + $0xa8] sm:$0xff]  ;;  %440 = vst [vmem:[%s5150_s17 + $0x48] sm:$0xff] %v439_v12 }
  0x1b   : >> { %426 = vst [vmem:[%s5150_s17 + $0x50] sm:$0xff] %v425_v5  ;;  %v427_v6 = vld [vmem:[%s5148_s16 + $0xc0] sm:$0xff]  ;;  %v443_v14 = vld [vmem:[%s5148_s16 + $0xc8] sm:$0xff]  ;;  %442 = vst [vmem:[%s5150_s17 + $0x58] sm:$0xff] %v441_v13 }
  0x1c   : >> { %v429_v7 = vld [vmem:[%s5148_s16 + $0xe0] sm:$0xff]  ;;  %428 = vst [vmem:[%s5150_s17 + $0x60] sm:$0xff] %v427_v6  ;;  %444 = vst [vmem:[%s5150_s17 + $0x68] sm:$0xff] %v443_v14  ;;  %v445_v15 = vld [vmem:[%s5148_s16 + $0xe8] sm:$0xff] }
  0x1d   : >> { %430 = vst [vmem:[%s5150_s17 + $0x70] sm:$0xff] %v429_v7  ;;  %446 = vst [vmem:[%s5150_s17 + $0x78] sm:$0xff] %v445_v15 }
  0x1f PF: > { %486 = sbr.rel (!%p5130_p3) target bundleno = 48 (0x30), region = 88  ;;  %s488_s19 = sand.u32 (%p5130_p3), 1, %s5027_s25  }
  0x20   : > { %s4670_s20 = smul.u32 (%p5130_p3), 288, %s5035_s27  ;;  %s4669_s21 = sshll.u32 (%p5130_p3), %s488_s19, 7 }
  0x21   : > { %s5202_s11 = scalar_lea.vmem (%p5130_p3), [#allocation3], %s4669_s21   ;;  %s5208_s30 = smov (%p5130_p3), 0  }
  0x22   : > { %s5199_s8 = scalar_lea.vmem (%p5130_p3), %s6024_s1, %s4670_s20 }
  0x23   : > { %s4423_s9 = scalar_lea.vmem (%p5130_p3), %s5199_s8, 16  }
  0x24   : > { %s6032_s12 = smov (%p5130_p3), %s4423_s9 }
  0x26 LB: >> { %v600_v16 = vld [vmem:[%s5047_s12] sm:$0xff]  ;;  %v616_v24 = vld [vmem:[%s5047_s12 + $0x8] sm:$0xff]  ;;  %s594_s30 = sadd.s32 1, %s5051_s30   ;;  %s5051_s30 = sphi %s5208_s30, %s594_s30   ;;  %s5047_s12 = sphi %s6032_s12, %s6033_s12  }
  0x27   : >> { %v602_v17 = vld [vmem:[%s5047_s12 + $0x20] sm:$0xff]  ;;  %601 = vst [vmem:[%s5202_s11] sm:$0xff] %v600_v16  ;;  %617 = vst [vmem:[%s5202_s11 + $0x8] sm:$0xff] %v616_v24  ;;  %v618_v25 = vld [vmem:[%s5047_s12 + $0x28] sm:$0xff]  ;;  %p593_p7 = scmp.ge.s32.totalorder %s594_s30, 1 }
  0x28   : >> { %v604_v18 = vld [vmem:[%s5047_s12 + $0x40] sm:$0xff]  ;;  %603 = vst [vmem:[%s5202_s11 + $0x10] sm:$0xff] %v602_v17  ;;  %v620_v26 = vld [vmem:[%s5047_s12 + $0x48] sm:$0xff]  ;;  %619 = vst [vmem:[%s5202_s11 + $0x18] sm:$0xff] %v618_v25 }
  0x29   : >> { %605 = vst [vmem:[%s5202_s11 + $0x20] sm:$0xff] %v604_v18  ;;  %v606_v19 = vld [vmem:[%s5047_s12 + $0x60] sm:$0xff]  ;;  %v622_v27 = vld [vmem:[%s5047_s12 + $0x68] sm:$0xff]  ;;  %621 = vst [vmem:[%s5202_s11 + $0x28] sm:$0xff] %v620_v26  ;;  %596 = sbr.rel (!%p593_p7) target bundleno = 38 (0x26), region = 248 }
  0x2a   : >> { %v608_v20 = vld [vmem:[%s5047_s12 + $0x80] sm:$0xff]  ;;  %607 = vst [vmem:[%s5202_s11 + $0x30] sm:$0xff] %v606_v19  ;;  %623 = vst [vmem:[%s5202_s11 + $0x38] sm:$0xff] %v622_v27  ;;  %v624_v28 = vld [vmem:[%s5047_s12 + $0x88] sm:$0xff] }
  0x2b   : >> { %v610_v21 = vld [vmem:[%s5047_s12 + $0xa0] sm:$0xff]  ;;  %609 = vst [vmem:[%s5202_s11 + $0x40] sm:$0xff] %v608_v20  ;;  %v626_v29 = vld [vmem:[%s5047_s12 + $0xa8] sm:$0xff]  ;;  %625 = vst [vmem:[%s5202_s11 + $0x48] sm:$0xff] %v624_v28 }
  0x2c   : >> { %611 = vst [vmem:[%s5202_s11 + $0x50] sm:$0xff] %v610_v21  ;;  %v612_v22 = vld [vmem:[%s5047_s12 + $0xc0] sm:$0xff]  ;;  %v628_v30 = vld [vmem:[%s5047_s12 + $0xc8] sm:$0xff]  ;;  %627 = vst [vmem:[%s5202_s11 + $0x58] sm:$0xff] %v626_v29 }
  0x2d   : >> { %v614_v23 = vld [vmem:[%s5047_s12 + $0xe0] sm:$0xff]  ;;  %613 = vst [vmem:[%s5202_s11 + $0x60] sm:$0xff] %v612_v22  ;;  %629 = vst [vmem:[%s5202_s11 + $0x68] sm:$0xff] %v628_v30  ;;  %v630_v31 = vld [vmem:[%s5047_s12 + $0xe8] sm:$0xff]  ;;  %s6033_s12 = smov %s4423_s9 }
  0x2e   : >> { %615 = vst [vmem:[%s5202_s11 + $0x70] sm:$0xff] %v614_v23  ;;  %631 = vst [vmem:[%s5202_s11 + $0x78] sm:$0xff] %v630_v31 }
  0x30 PF: > { %p4681_p8 = scmp.ge.s32.totalorder %s5039_s28, 1  ;;  %p686_p9 = scmp.lt.s32.totalorder %s5039_s28, 3 }
  0x32   : > { %p687_p10 = pnand %p4681_p8, %p686_p9 }
  0x33   : > { %v1897_v32 = vld [vmem:[%s6026_s3] sm:$0xff] (!%p687_p10)  ;;  %s693_s17 = sand.u32 (!%p687_p10), 1, %s5023_s24   ;;  %v859_v34 = vlaneseq (!%p687_p10)  ;;  %v5053_v35 = vmov (!%p687_p10), 0.0   ;;  %vm5054_vm0 = vmmov (!%p687_p10), 0   ;;  %v5055_v37 = vmov (!%p687_p10), 1966171168  }
  0x34   : > { %690 = sbr.rel (%p687_p10) target bundleno = 789 (0x315), region = 144  ;;  %v2468_v33 = vld [vmem:[%s6027_s4] sm:$0xff] (!%p687_p10)  ;;  %4776 = vmatprep.subr.mxu1 (!%p687_p10), %v5053_v35  ;;  %4805 = vmatprep.subr.mxu0 (!%p687_p10), %v5053_v35  ;;  %s4682_s20 = sshll.u32 (!%p687_p10), %s693_s17, 7  ;;  %v857_v38 = vunpack.c.l.s4 (!%p687_p10), %v5055_v37  ;;  %vm2339_vm1 = vcmask (!%p687_p10), 64512   ;;  %vm3138_vm2 = vcmask (!%p687_p10), 1046528   ;;  %vm4324_vm3 = vcmask (!%p687_p10), 24576  }
  0x35   : > { %v5269_v36 = vld [vmem:[%s6028_s5] sm:$0xff] (!%p687_p10)  ;;  %4777 = vmatpush3.msra.mxu1 (!%p687_p10), %v1897_v32  ;;  %4778 = vmatprep.mubr.msk.f32.mxu1 (!%p687_p10), %vm5054_vm0, %v5053_v35  ;;  %v860_v39 = vshrl.u32 (!%p687_p10), %v859_v34, 7  ;;  %s5275_s24 = scalar_lea.vmem (!%p687_p10), [#allocation2], %s4682_s20  ;;  %s5278_s21 = scalar_lea.vmem (!%p687_p10), [#allocation3], %s4682_s20  ;;  %vm4322_vm4 = vcmask (!%p687_p10), 31744  }
  0x36   : > { %4806 = vmatpush3.msra.mxu0 (!%p687_p10), %v2468_v33  ;;  %4807 = vmatprep.mubr.msk.f32.mxu0 (!%p687_p10), %vm5054_vm0, %v5053_v35  ;;  %v823_v40 = vld [vmem:[%s5275_s24] sm:$0xff] (!%p687_p10)  ;;  %v858_v43 = vunpack.c.0.s8 (!%p687_p10), %v857_v38  ;;  %v825_v45 = vld [vmem:[%s5275_s24 + $0x10] sm:$0xff] (!%p687_p10)  ;;  %v5287_v47 = vld.sshfl [vmem:[%s5275_s24 + $0x8] sm:$0x1 pattern:$0x75316420] (!%p687_p10) }
  0x37   : > { %v1359_v41 = vld [vmem:[%s5278_s21] sm:$0xff] (!%p687_p10)  ;;  %4834 = vmatprep.subr.mxu1 (!%p687_p10), %v5269_v36  ;;  %v855_v42 = vcombine.high (!%p687_p10), %v823_v40, %v823_v40  ;;  %v5284_v46 = vld [vmem:[%s5278_s21 + $0x10] sm:$0xff] (!%p687_p10)  ;;  %v918_v48 = vcombine.high (!%p687_p10), %v825_v45, %v825_v45  ;;  %v5298_v52 = vld.sshfl [vmem:[%s5278_s21 + $0x8] sm:$0x1 pattern:$0x75316420] (!%p687_p10) }
  0x38   : > { %v1391_v44 = vcombine.high (!%p687_p10), %v1359_v41, %v1359_v41  ;;  %v5290_v49 = vld [vmem:[%s5275_s24 + $0x20] sm:$0xff] (!%p687_p10)  ;;  %v5295_v51 = vsub.s32 (!%p687_p10), %v858_v43, %v860_v39  ;;  %v1454_v53 = vcombine.high (!%p687_p10), %v5284_v46, %v5284_v46  ;;  %v5303_v54 = vld [vmem:[%s5275_s24 + $0x30] sm:$0xff] (!%p687_p10)  ;;  %p783_p11 = scmp.lt.s32.totalorder (!%p687_p10), %s5031_s26, 1  ;;  %s5056_s12 = smov (!%p687_p10), 124  }
  0x39   : > { %v5293_v50 = vld [vmem:[%s5278_s21 + $0x20] sm:$0xff] (!%p687_p10)  ;;  %v5306_v55 = vld [vmem:[%s5278_s21 + $0x30] sm:$0xff] (!%p687_p10)  ;;  %v981_v56 = vcombine.high (!%p687_p10), %v5290_v49, %v5290_v49  ;;  %v1044_v58 = vcombine.high (!%p687_p10), %v5303_v54, %v5303_v54  ;;  %s5057_s30 = smov (!%p687_p10), 8   ;;  %s5058_s13 = smov (!%p687_p10), 120  }
  0x3a   : > { %v1517_v57 = vcombine.high (!%p687_p10), %v5293_v50, %v5293_v50  ;;  %v1580_v59 = vcombine.high (!%p687_p10), %v5306_v55, %v5306_v55  ;;  %v862_v60 = vrot.slane (!%p687_p10), %v823_v40, %v5295_v51  ;;  %v869_v61 = vrot.slane (!%p687_p10), %v855_v42, %v5295_v51 }
  0x3b   : > { %v1398_v62 = vrot.slane %v1359_v41, %v5295_v51  ;;  %v1405_v63 = vrot.slane %v1391_v44, %v5295_v51  ;;  %v917_v0 = vrot.slane %v5287_v47, %v5295_v51  ;;  %v925_v1 = vrot.slane %v825_v45, %v5295_v51  ;;  %s6041_s26 = smov (!%p783_p11, %s5031_s26), 1 }
  0x3c   : > { %v932_v2 = vrot.slane %v918_v48, %v5295_v51  ;;  %v1453_v3 = vrot.slane %v5298_v52, %v5295_v51  ;;  %v870_v4 = vcombine.high %v862_v60, %v862_v60  ;;  %v871_v5 = vcombine.high %v869_v61, %v869_v61  ;;  %s4842_s22 = smul.u32 288, %s6041_s26  ;;  %s4752_s16 = sshll.u32 %s6041_s26, 7 }
  0x3d   : > { %v878_v6 = vrot.slane %v862_v60, %v5295_v51  ;;  %v885_v7 = vrot.slane %v869_v61, %v5295_v51  ;;  %v1406_v8 = vcombine.high %v1398_v62, %v1398_v62  ;;  %v1407_v9 = vcombine.high %v1405_v63, %v1405_v63  ;;  %s5817_s26 = scalar_lea.vmem %s6030_s7, %s4752_s16 }
  0x3e   : > { %v1414_v10 = vrot.slane %v1398_v62, %v5295_v51  ;;  %v1421_v11 = vrot.slane %v1405_v63, %v5295_v51  ;;  %v892_v12 = vrot.slane %v870_v4, %v5295_v51  ;;  %v899_v13 = vrot.slane %v871_v5, %v5295_v51  ;;  %s4751_s23 = sadd.s32 256, %s4842_s22 }
  0x3f   : > { %v933_v14 = vcombine.high %v925_v1, %v925_v1  ;;  %v934_v15 = vcombine.high %v932_v2, %v932_v2  ;;  %v1428_v16 = vrot.slane %v1406_v8, %v5295_v51  ;;  %v1435_v17 = vrot.slane %v1407_v9, %v5295_v51  ;;  %s791_s11 = scalar_lea.vmem %s6025_s2, %s4751_s23 }
  0x40   : > { %v941_v18 = vrot.slane %v925_v1, %v5295_v51  ;;  %v948_v19 = vrot.slane %v932_v2, %v5295_v51  ;;  %v1898_v20 = vcombine.low %v878_v6, %v892_v12  ;;  %v4703_v21 = vcombine.high %v878_v6, %v892_v12 }
  0x41   : > { %v1900_v22 = vcombine.low %v885_v7, %v899_v13  ;;  %v4704_v23 = vcombine.high %v885_v7, %v899_v13  ;;  %v2469_v24 = vcombine.low %v1414_v10, %v1428_v16  ;;  %v4720_v25 = vcombine.high %v1414_v10, %v1428_v16 }
  0x42   : > { %v2471_v26 = vcombine.low %v1421_v11, %v1435_v17  ;;  %v4721_v27 = vcombine.high %v1421_v11, %v1435_v17  ;;  %v1908_v28 = vrot.slane %v1898_v20, %v5295_v51  ;;  %v1915_v29 = vrot.slane %v4703_v21, %v5295_v51 }
  0x43   : > { %v1922_v30 = vrot.slane %v1900_v22, %v5295_v51  ;;  %v1929_v31 = vrot.slane %v4704_v23, %v5295_v51  ;;  %v2479_v32 = vrot.slane %v2469_v24, %v5295_v51  ;;  %v2486_v33 = vrot.slane %v4720_v25, %v5295_v51 }
  0x44   : > { %v2493_v34 = vrot.slane %v2471_v26, %v5295_v51  ;;  %v2500_v37 = vrot.slane %v4721_v27, %v5295_v51  ;;  %v1930_v38 = vcombine.low %v1908_v28, %v1915_v29  ;;  %v955_v40 = vrot.slane %v933_v14, %v5295_v51 }
  0x45   : > { %v1931_v39 = vcombine.low %v1922_v30, %v1929_v31  ;;  %v962_v41 = vrot.slane %v934_v15, %v5295_v51  ;;  %v2501_v42 = vcombine.low %v2479_v32, %v2486_v33  ;;  %v963_v44 = vcombine.high %v941_v18, %v941_v18  ;;  %v4696_v33 = vld.sshfl [vmem:[%s5278_s21 + $0x18] sm:$0x1 pattern:$0x75316420] }
  0x46   : > { %v2502_v43 = vcombine.low %v2493_v34, %v2500_v37  ;;  %v964_v45 = vcombine.high %v948_v19, %v948_v19  ;;  %v1938_v47 = vrot.slane %v1930_v38, %v5295_v51  ;;  %v965_v60 = vcombine.high %v955_v40, %v955_v40 }
  0x47   : > { %v1945_v48 = vrot.slane %v1931_v39, %v5295_v51  ;;  %v1947_v61 = vcombine.low %v917_v0, %v941_v18  ;;  %v2509_v62 = vrot.slane %v2501_v42, %v5295_v51  ;;  %v1948_v1 = vcombine.low %v955_v40, %v963_v44  ;;  %v4688_v18 = vld.sshfl [vmem:[%s5275_s24 + $0x18] sm:$0x1 pattern:$0x75316420] }
  0x48   : > { %v2516_v63 = vrot.slane %v2502_v43, %v5295_v51  ;;  %v1950_v2 = vcombine.low %v962_v41, %v964_v45  ;;  %v1949_v5 = vcombine.low %v965_v60, %v948_v19  ;;  %v1461_v7 = vrot.slane %v5284_v46, %v5295_v51 }
  0x49   : > { %v1946_v4 = vcombine.low %v1938_v47, %v1945_v48  ;;  %v1957_v6 = vrot.slane %v1947_v61, %v5295_v51  ;;  %v1964_v9 = vrot.slane %v1948_v1, %v5295_v51  ;;  %v1468_v0 = vrot.slane %v1454_v53, %v5295_v51 }
  0x4a   : > { %v2517_v8 = vcombine.low %v2509_v62, %v2516_v63  ;;  %v1978_v10 = vrot.slane %v1950_v2, %v5295_v51  ;;  %v1971_v11 = vrot.slane %v1949_v5, %v5295_v51  ;;  %v1469_v12 = vcombine.high %v1461_v7, %v1461_v7 }
  0x4b   : > { %4779 = vmatmul.mubr.msk.f32.vlgmr.msra.gmra.mrb[0].mxu1 %vm2339_vm1, %v1946_v4  ;;  %v1477_v13 = vrot.slane %v1461_v7, %v5295_v51  ;;  %v966_v14 = vcombine.high %v962_v41, %v962_v41  ;;  %v1979_v15 = vcombine.low %v1957_v6, %v1964_v9  ;;  %v1470_v16 = vcombine.high %v1468_v0, %v1468_v0 }
  0x4c   : > { %4808 = vmatmul.mubr.msk.f32.vlgmr.msra.gmra.mrb[0].mxu0 %vm2339_vm1, %v2517_v8  ;;  %4835 = vmatpush3.msra.mxu1 %v5269_v36  ;;  %v1484_v17 = vrot.slane %v1468_v0, %v5295_v51  ;;  %v1980_v46 = vcombine.low %v1971_v11, %v1978_v10  ;;  %v1491_v53 = vrot.slane %v1469_v12, %v5295_v51  ;;  %v4689_v8 = vld.sshfl [vmem:[%s5275_s24 + $0x28] sm:$0x1 pattern:$0x75316420] }
  0x4d   : > { %4781 = vmatprep.mubr.msk.f32.mxu1 %vm5054_vm0, %v5053_v35  ;;  %4810 = vmatprep.mubr.msk.f32.mxu0 %vm5054_vm0, %v5053_v35  ;;  %v1499_v19 = vcombine.high %v1477_v13, %v1477_v13  ;;  %v1987_v20 = vrot.slane %v1979_v15, %v5295_v51  ;;  %v1498_v36 = vrot.slane %v1470_v16, %v5295_v51 }
  0x4e   : > { %v1500_v21 = vcombine.high %v1484_v17, %v1484_v17  ;;  %v2518_v22 = vcombine.low %v1453_v3, %v1477_v13  ;;  %v1994_v23 = vrot.slane %v1980_v46, %v5295_v51  ;;  %v1501_v24 = vcombine.high %v1491_v53, %v1491_v53 }
  0x4f   : > { %v2519_v25 = vcombine.low %v1491_v53, %v1499_v19  ;;  %v980_v26 = vrot.slane %v4688_v18, %v5295_v51  ;;  %v988_v29 = vrot.slane %v5290_v49, %v5295_v51  ;;  %v995_v30 = vrot.slane %v981_v56, %v5295_v51 }
  0x50   : > { %v2521_v27 = vcombine.low %v1498_v36, %v1500_v21  ;;  %v2528_v28 = vrot.slane %v2518_v22, %v5295_v51  ;;  %v1995_v31 = vcombine.low %v1987_v20, %v1994_v23  ;;  %v2520_v52 = vcombine.low %v1501_v24, %v1484_v17  ;;  %v4697_v23 = vld.sshfl [vmem:[%s5278_s21 + $0x28] sm:$0x1 pattern:$0x75316420] }
  0x51   : > { %v2535_v3 = vrot.slane %v2519_v25, %v5295_v51  ;;  %v1996_v32 = vcombine.low %v966_v14, %v980_v26  ;;  %v996_v37 = vcombine.high %v988_v29, %v988_v29  ;;  %v997_v38 = vcombine.high %v995_v30, %v995_v30 }
  0x52   : > { %v2549_v34 = vrot.slane %v2521_v27, %v5295_v51  ;;  %v1004_v39 = vrot.slane %v988_v29, %v5295_v51  ;;  %4782 = vmatmul.mubr.msk.f32.gmra.mrb[2].mxu1 %vm2339_vm1, %v1995_v31  ;;  %v2542_v40 = vrot.slane %v2520_v52, %v5295_v51  ;;  %v1011_v49 = vrot.slane %v995_v30, %v5295_v51 }
  0x53   : > { %v2550_v41 = vcombine.low %v2528_v28, %v2535_v3  ;;  %v2006_v56 = vrot.slane %v1996_v32, %v5295_v51  ;;  %4784 = vmatprep.mubr.msk.f32.mxu1 %vm5054_vm0, %v5053_v35  ;;  %v1018_v42 = vrot.slane %v996_v37, %v5295_v51  ;;  %v1025_v43 = vrot.slane %v997_v38, %v5295_v51 }
  0x54   : > { %v1502_v44 = vcombine.high %v1498_v36, %v1498_v36  ;;  %v1516_v45 = vrot.slane %v4696_v33, %v5295_v51  ;;  %v2551_v47 = vcombine.low %v2542_v40, %v2549_v34  ;;  %v1524_v60 = vrot.slane %v5293_v50, %v5295_v51 }
  0x55   : > { %v2558_v48 = vrot.slane %v2550_v41, %v5295_v51  ;;  %v1531_v61 = vrot.slane %v1517_v57, %v5295_v51  ;;  %v1997_v62 = vcombine.low %v1004_v39, %v1018_v42  ;;  %v4705_v63 = vcombine.high %v1004_v39, %v1018_v42 }
  0x56   : > { %v1999_v1 = vcombine.low %v1011_v49, %v1025_v43  ;;  %v2567_v2 = vcombine.low %v1502_v44, %v1516_v45  ;;  %v2565_v4 = vrot.slane %v2551_v47, %v5295_v51  ;;  %v1532_v5 = vcombine.high %v1524_v60, %v1524_v60 }
  0x57   : > { %v1533_v6 = vcombine.high %v1531_v61, %v1531_v61  ;;  %v1540_v7 = vrot.slane %v1524_v60, %v5295_v51  ;;  %v2013_v9 = vrot.slane %v1997_v62, %v5295_v51  ;;  %v2020_v10 = vrot.slane %v4705_v63, %v5295_v51 }
  0x58   : > { %v2027_v0 = vrot.slane %v1999_v1, %v5295_v51  ;;  %v1547_v50 = vrot.slane %v1531_v61, %v5295_v51  ;;  %v2566_v57 = vcombine.low %v2558_v48, %v2565_v4  ;;  %v1554_v11 = vrot.slane %v1532_v5, %v5295_v51  ;;  %v4690_v1 = vld.sshfl [vmem:[%s5275_s24 + $0x38] sm:$0x1 pattern:$0x75316420] }
  0x59   : > { %v1561_v12 = vrot.slane %v1533_v6, %v5295_v51  ;;  %v2577_v13 = vrot.slane %v2567_v2, %v5295_v51  ;;  %v2028_v14 = vcombine.low %v2006_v56, %v2013_v9  ;;  %v1043_v16 = vrot.slane %v4689_v8, %v5295_v51 }
  0x5a   : > { %v2029_v15 = vcombine.low %v2020_v10, %v2027_v0  ;;  %v1051_v17 = vrot.slane %v5303_v54, %v5295_v51  ;;  %4811 = vmatmul.mubr.msk.f32.gmra.mrb[2].mxu0 %vm2339_vm1, %v2566_v57  ;;  %v2568_v18 = vcombine.low %v1540_v7, %v1554_v11  ;;  %v4722_v46 = vcombine.high %v1540_v7, %v1554_v11 }
  0x5b   : > { %v2570_v53 = vcombine.low %v1547_v50, %v1561_v12  ;;  %v1058_v19 = vrot.slane %v1044_v58, %v5295_v51  ;;  %4813 = vmatprep.mubr.msk.f32.mxu0 %vm5054_vm0, %v5053_v35  ;;  %v2036_v20 = vrot.slane %v2028_v14, %v5295_v51  ;;  %v4706_v29 = vcombine.high %v1011_v49, %v1025_v43 }
  0x5c   : > { %v2043_v36 = vrot.slane %v2029_v15, %v5295_v51  ;;  %v1059_v21 = vcombine.high %v1051_v17, %v1051_v17  ;;  %v1067_v22 = vrot.slane %v1051_v17, %v5295_v51  ;;  %v2584_v24 = vrot.slane %v2568_v18, %v5295_v51 }
  0x5d   : > { %v2591_v25 = vrot.slane %v4722_v46, %v5295_v51  ;;  %v2598_v26 = vrot.slane %v2570_v53, %v5295_v51  ;;  %v1074_v54 = vrot.slane %v1058_v19, %v5295_v51  ;;  %v1579_v3 = vrot.slane %v4697_v23, %v5295_v51  ;;  %v4698_v46 = vld.sshfl [vmem:[%s5278_s21 + $0x38] sm:$0x1 pattern:$0x75316420]  ;;  %v1367_v53 = vld [vmem:[%s5278_s21 + $0x40] sm:$0xff] }
  0x5e   : > { %v2044_v58 = vcombine.low %v2036_v20, %v2043_v36  ;;  %v1081_v27 = vrot.slane %v1059_v21, %v5295_v51  ;;  %v1089_v28 = vcombine.high %v1067_v22, %v1067_v22  ;;  %v2599_v30 = vcombine.low %v2577_v13, %v2584_v24 }
  0x5f   : > { %v2600_v31 = vcombine.low %v2591_v25, %v2598_v26  ;;  %v2046_v52 = vcombine.low %v1043_v16, %v1067_v22  ;;  %v2055_v34 = vrot.slane %v4706_v29, %v5295_v51  ;;  %v1587_v37 = vrot.slane %v5306_v55, %v5295_v51  ;;  %v5461_v55 = vld [vmem:[%s5275_s24 + $0x40] sm:$0xff] }
  0x60   : > { %4785 = vmatmul.mubr.msk.f32.gmra.mrb[4].mxu1 %vm2339_vm1, %v2044_v58  ;;  %v1091_v32 = vcombine.high %v1081_v27, %v1081_v27  ;;  %v2047_v33 = vcombine.low %v1081_v27, %v1089_v28  ;;  %v2607_v38 = vrot.slane %v2599_v30, %v5295_v51  ;;  %v1594_v41 = vrot.slane %v1580_v59, %v5295_v51 }
  0x61   : > { %v2614_v39 = vrot.slane %v2600_v31, %v5295_v51  ;;  %4787 = vmatprep.mubr.msk.f32.mxu1 %vm5054_vm0, %v5053_v35  ;;  %v2062_v40 = vrot.slane %v2046_v52, %v5295_v51  ;;  %v1595_v42 = vcombine.high %v1587_v37, %v1587_v37  ;;  %v1603_v43 = vrot.slane %v1587_v37, %v5295_v51  ;;  %v833_v37 = vld [vmem:[%s5275_s24 + $0x50] sm:$0xff] }
  0x62   : > { %v2048_v49 = vcombine.low %v1091_v32, %v1074_v54  ;;  %v2069_v56 = vrot.slane %v2047_v33, %v5295_v51  ;;  %v1610_v47 = vrot.slane %v1594_v41, %v5295_v51  ;;  %v4723_v48 = vcombine.high %v1547_v50, %v1561_v12 }
  0x63   : > { %v2615_v44 = vcombine.low %v2607_v38, %v2614_v39  ;;  %v2077_v45 = vcombine.low %v2055_v34, %v2062_v40  ;;  %v1617_v61 = vrot.slane %v1595_v42, %v5295_v51  ;;  %v1625_v62 = vcombine.high %v1603_v43, %v1603_v43  ;;  %v4691_v34 = vld.sshfl [vmem:[%s5275_s24 + $0x48] sm:$0x1 pattern:$0x75316420] }
  0x64   : > { %v2076_v60 = vrot.slane %v2048_v49, %v5295_v51  ;;  %v2617_v63 = vcombine.low %v1579_v3, %v1603_v43  ;;  %v2626_v2 = vrot.slane %v4723_v48, %v5295_v51  ;;  %v1060_v4 = vcombine.high %v1058_v19, %v1058_v19 }
  0x65   : > { %4814 = vmatmul.mubr.msk.f32.gmra.mrb[4].mxu0 %vm2339_vm1, %v2615_v44  ;;  %v2085_v59 = vrot.slane %v2077_v45, %v5295_v51  ;;  %v1090_v5 = vcombine.high %v1074_v54, %v1074_v54  ;;  %v1627_v7 = vcombine.high %v1617_v61, %v1617_v61  ;;  %v2618_v8 = vcombine.low %v1617_v61, %v1625_v62 }
  0x66   : > { %4816 = vmatprep.mubr.msk.f32.mxu0 %vm5054_vm0, %v5053_v35  ;;  %v2078_v6 = vcombine.low %v2069_v56, %v2076_v60  ;;  %v2633_v9 = vrot.slane %v2617_v63, %v5295_v51  ;;  %v1088_v10 = vrot.slane %v1060_v4, %v5295_v51  ;;  %v1106_v0 = vrot.slane %v4690_v1, %v5295_v51 }
  0x67   : > { %v1114_v50 = vrot.slane %v5461_v55, %v5295_v51  ;;  %v1596_v57 = vcombine.high %v1594_v41, %v1594_v41  ;;  %v2619_v12 = vcombine.low %v1627_v7, %v1610_v47  ;;  %v2640_v13 = vrot.slane %v2618_v8, %v5295_v51  ;;  %v4699_v8 = vld.sshfl [vmem:[%s5278_s21 + $0x48] sm:$0x1 pattern:$0x75316420] }
  0x68   : > { %v2092_v11 = vrot.slane %v2078_v6, %v5295_v51  ;;  %v2648_v14 = vcombine.low %v2626_v2, %v2633_v9  ;;  %v1092_v15 = vcombine.high %v1088_v10, %v1088_v10  ;;  %v2094_v18 = vcombine.low %v1088_v10, %v1090_v5  ;;  %v5514_v9 = vld [vmem:[%s5278_s21 + $0x50] sm:$0xff] }
  0x69   : > { %v1122_v16 = vcombine.high %v1114_v50, %v1114_v50  ;;  %v1130_v17 = vrot.slane %v1114_v50, %v5295_v51  ;;  %v2647_v20 = vrot.slane %v2619_v12, %v5295_v51  ;;  %v1624_v21 = vrot.slane %v1596_v57, %v5295_v51 }
  0x6a   : > { %v2093_v19 = vcombine.low %v2085_v59, %v2092_v11  ;;  %v2656_v36 = vrot.slane %v2648_v14, %v5295_v51  ;;  %v2095_v23 = vcombine.low %v1092_v15, %v1106_v0  ;;  %v2104_v24 = vrot.slane %v2094_v18, %v5295_v51 }
  0x6b   : > { %v1144_v22 = vrot.slane %v1122_v16, %v5295_v51  ;;  %v1626_v25 = vcombine.high %v1610_v47, %v1610_v47  ;;  %v2649_v26 = vcombine.low %v2640_v13, %v2647_v20  ;;  %v1628_v54 = vcombine.high %v1624_v21, %v1624_v21 }
  0x6c   : > { %4788 = vmatmul.mubr.msk.f32.gmra.mrb[6].mxu1 %vm2339_vm1, %v2093_v19  ;;  %v1642_v58 = vrot.slane %v4698_v46, %v5295_v51  ;;  %v1650_v27 = vrot.slane %v1367_v53, %v5295_v51  ;;  %v2111_v30 = vrot.slane %v2095_v23, %v5295_v51  ;;  %v1107_v43 = vcombine.high %v5461_v55, %v5461_v55 }
  0x6d   : > { %4790 = vmatprep.mubr.msk.f32.mxu1 %vm5054_vm0, %v5053_v35  ;;  %v2096_v28 = vcombine.low %v1130_v17, %v1144_v22  ;;  %v4707_v29 = vcombine.high %v1130_v17, %v1144_v22  ;;  %v2665_v31 = vcombine.low %v1624_v21, %v1626_v25  ;;  %v2663_v52 = vrot.slane %v2649_v26, %v5295_v51 }
  0x6e   : > { %v1658_v3 = vcombine.high %v1650_v27, %v1650_v27  ;;  %v1666_v32 = vrot.slane %v1650_v27, %v5295_v51  ;;  %v2666_v33 = vcombine.low %v1628_v54, %v1642_v58  ;;  %v2126_v40 = vcombine.low %v2104_v24, %v2111_v30 }
  0x6f   : > { %v2118_v38 = vrot.slane %v2096_v28, %v5295_v51  ;;  %v2125_v39 = vrot.slane %v4707_v29, %v5295_v51  ;;  %v2675_v41 = vrot.slane %v2665_v31, %v5295_v51  ;;  %v2664_v49 = vcombine.low %v2656_v36, %v2663_v52 }
  0x70   : > { %v1680_v56 = vrot.slane %v1658_v3, %v5295_v51  ;;  %v2682_v42 = vrot.slane %v2666_v33, %v5295_v51  ;;  %v2134_v45 = vrot.slane %v2126_v40, %v5295_v51  ;;  %v1169_v47 = vrot.slane %v4691_v34, %v5295_v51  ;;  %v4692_v3 = vld.sshfl [vmem:[%s5275_s24 + $0x58] sm:$0x1 pattern:$0x75316420] }
  0x71   : > { %v2127_v44 = vcombine.low %v2118_v38, %v2125_v39  ;;  %v1177_v48 = vrot.slane %v833_v37, %v5295_v51  ;;  %4817 = vmatmul.mubr.msk.f32.gmra.mrb[6].mxu0 %vm2339_vm1, %v2664_v49  ;;  %v1121_v63 = vrot.slane %v1107_v43, %v5295_v51  ;;  %v1643_v2 = vcombine.high %v1367_v53, %v1367_v53  ;;  %v835_v38 = vld [vmem:[%s5275_s24 + $0x60] sm:$0xff] }
  0x72   : > { %v2667_v60 = vcombine.low %v1666_v32, %v1680_v56  ;;  %v4724_v61 = vcombine.high %v1666_v32, %v1680_v56  ;;  %v2697_v62 = vcombine.low %v2675_v41, %v2682_v42  ;;  %4819 = vmatprep.mubr.msk.f32.mxu0 %vm5054_vm0, %v5053_v35  ;;  %v1705_v16 = vrot.slane %v4699_v8, %v5295_v51 }
  0x73   : > { %v2141_v1 = vrot.slane %v2127_v44, %v5295_v51  ;;  %v1185_v55 = vcombine.high %v1177_v48, %v1177_v48  ;;  %v1193_v59 = vrot.slane %v1177_v48, %v5295_v51  ;;  %v1123_v7 = vcombine.high %v1121_v63, %v1121_v63 }
  0x74   : > { %v2689_v4 = vrot.slane %v2667_v60, %v5295_v51  ;;  %v2696_v5 = vrot.slane %v4724_v61, %v5295_v51  ;;  %v2705_v6 = vrot.slane %v2697_v62, %v5295_v51  ;;  %v1137_v0 = vrot.slane %v1121_v63, %v5295_v51 }
  0x75   : > { %v2142_v10 = vcombine.low %v2134_v45, %v2141_v1  ;;  %v1207_v50 = vrot.slane %v1185_v55, %v5295_v51  ;;  %v1215_v57 = vcombine.high %v1193_v59, %v1193_v59  ;;  %v1151_v12 = vrot.slane %v1123_v7, %v5295_v51 }
  0x76   : > { %v2698_v11 = vcombine.low %v2689_v4, %v2696_v5  ;;  %v2145_v13 = vcombine.low %v1169_v47, %v1193_v59  ;;  %v1657_v14 = vrot.slane %v1643_v2, %v5295_v51  ;;  %v1713_v17 = vrot.slane %v5514_v9, %v5295_v51 }
  0x77   : > { %4791 = vmatmul.mubr.msk.f32.gmra.mrb[8].mxu1 %vm2339_vm1, %v2142_v10  ;;  %v2146_v15 = vcombine.low %v1207_v50, %v1215_v57  ;;  %v1170_v18 = vcombine.high %v833_v37, %v833_v37  ;;  %v2143_v53 = vcombine.low %v1137_v0, %v1151_v12  ;;  %v4708_v19 = vcombine.high %v1137_v0, %v1151_v12  ;;  %v1371_v0 = vld [vmem:[%s5278_s21 + $0x60] sm:$0xff] }
  0x78   : > { %v2712_v46 = vrot.slane %v2698_v11, %v5295_v51  ;;  %4793 = vmatprep.mubr.msk.f32.mxu1 %vm5054_vm0, %v5053_v35  ;;  %v2167_v20 = vrot.slane %v2145_v13, %v5295_v51  ;;  %v1659_v21 = vcombine.high %v1657_v14, %v1657_v14  ;;  %v1673_v22 = vrot.slane %v1657_v14, %v5295_v51 }
  0x79   : > { %v2174_v36 = vrot.slane %v2146_v15, %v5295_v51  ;;  %v1721_v23 = vcombine.high %v1713_v17, %v1713_v17  ;;  %v2153_v25 = vrot.slane %v2143_v53, %v5295_v51  ;;  %v2160_v26 = vrot.slane %v4708_v19, %v5295_v51 }
  0x7a   : > { %v2713_v24 = vcombine.low %v2705_v6, %v2712_v46  ;;  %v1729_v54 = vrot.slane %v1713_v17, %v5295_v51  ;;  %v1687_v27 = vrot.slane %v1659_v21, %v5295_v51  ;;  %v1184_v29 = vrot.slane %v1170_v18, %v5295_v51  ;;  %v4700_v6 = vld.sshfl [vmem:[%s5278_s21 + $0x58] sm:$0x1 pattern:$0x75316420] }
  0x7b   : > { %v2176_v58 = vcombine.low %v2167_v20, %v2174_v36  ;;  %v1743_v28 = vrot.slane %v1721_v23, %v5295_v51  ;;  %v2175_v30 = vcombine.low %v2153_v25, %v2160_v26  ;;  %v1217_v32 = vcombine.high %v1207_v50, %v1207_v50  ;;  %v4693_v21 = vld.sshfl [vmem:[%s5275_s24 + $0x68] sm:$0x1 pattern:$0x75316420] }
  0x7c   : > { %4820 = vmatmul.mubr.msk.f32.gmra.mrb[8].mxu0 %vm2339_vm1, %v2713_v24  ;;  %v1751_v31 = vcombine.high %v1729_v54, %v1729_v54  ;;  %v2716_v52 = vcombine.low %v1705_v16, %v1729_v54  ;;  %v2714_v34 = vcombine.low %v1673_v22, %v1687_v27  ;;  %v4725_v37 = vcombine.high %v1673_v22, %v1687_v27 }
  0x7d   : > { %4822 = vmatprep.mubr.msk.f32.mxu0 %vm5054_vm0, %v5053_v35  ;;  %v2190_v33 = vrot.slane %v2176_v58, %v5295_v51  ;;  %v1186_v39 = vcombine.high %v1184_v29, %v1184_v29  ;;  %v2183_v40 = vrot.slane %v2175_v30, %v5295_v51  ;;  %v1200_v56 = vrot.slane %v1184_v29, %v5295_v51 }
  0x7e   : > { %v2717_v41 = vcombine.low %v1743_v28, %v1751_v31  ;;  %v2738_v49 = vrot.slane %v2716_v52, %v5295_v51  ;;  %v2724_v42 = vrot.slane %v2714_v34, %v5295_v51  ;;  %v2731_v43 = vrot.slane %v4725_v37, %v5295_v51 }
  0x7f   : > { %v1214_v44 = vrot.slane %v1186_v39, %v5295_v51  ;;  %v1232_v45 = vrot.slane %v4692_v3, %v5295_v51  ;;  %v2191_v47 = vcombine.low %v2183_v40, %v2190_v33  ;;  %v1216_v60 = vcombine.high %v1200_v56, %v1200_v56 }
  0x80   : > { %v2745_v48 = vrot.slane %v2717_v41, %v5295_v51  ;;  %v1240_v61 = vrot.slane %v835_v38, %v5295_v51  ;;  %v2746_v62 = vcombine.low %v2724_v42, %v2731_v43  ;;  %v2192_v1 = vcombine.low %v1217_v32, %v1200_v56  ;;  %v4701_v43 = vld.sshfl [vmem:[%s5278_s21 + $0x68] sm:$0x1 pattern:$0x75316420] }
  0x81   : > { %v1218_v63 = vcombine.high %v1214_v44, %v1214_v44  ;;  %v1706_v55 = vcombine.high %v5514_v9, %v5514_v9  ;;  %4794 = vmatmul.mubr.msk.f32.gmra.mrb[10].mxu1 %vm2339_vm1, %v2191_v47  ;;  %v2193_v5 = vcombine.low %v1214_v44, %v1216_v60  ;;  %v1753_v12 = vcombine.high %v1743_v28, %v1743_v28  ;;  %v837_v28 = vld [vmem:[%s5275_s24 + $0x70] sm:$0xff] }
  0x82   : > { %v2747_v59 = vcombine.low %v2738_v49, %v2745_v48  ;;  %v1248_v2 = vcombine.high %v1240_v61, %v1240_v61  ;;  %v1256_v4 = vrot.slane %v1240_v61, %v5295_v51  ;;  %v2754_v7 = vrot.slane %v2746_v62, %v5295_v51  ;;  %4796 = vmatprep.mubr.msk.f32.mxu1 %vm5054_vm0, %v5053_v35 }
  0x83   : > { %v2194_v8 = vcombine.low %v1218_v63, %v1232_v45  ;;  %v2202_v10 = vrot.slane %v2192_v1, %v5295_v51  ;;  %v1720_v50 = vrot.slane %v1706_v55, %v5295_v51  ;;  %v2209_v11 = vrot.slane %v2193_v5, %v5295_v51  ;;  %v1373_v1 = vld [vmem:[%s5278_s21 + $0x70] sm:$0xff] }
  0x84   : > { %v2761_v9 = vrot.slane %v2747_v59, %v5295_v51  ;;  %v1270_v57 = vrot.slane %v1248_v2, %v5295_v51  ;;  %v1768_v16 = vrot.slane %v4700_v6, %v5295_v51  ;;  %v1776_v53 = vrot.slane %v1371_v0, %v5295_v51 }
  0x85   : > { %v2216_v13 = vrot.slane %v2194_v8, %v5295_v51  ;;  %v1722_v14 = vcombine.high %v1720_v50, %v1720_v50  ;;  %v1736_v15 = vrot.slane %v1720_v50, %v5295_v51  ;;  %v2224_v46 = vcombine.low %v2202_v10, %v2209_v11 }
  0x86   : > { %v2762_v17 = vcombine.low %v2754_v7, %v2761_v9  ;;  %v2195_v18 = vcombine.low %v1256_v4, %v1270_v57  ;;  %v1233_v22 = vcombine.high %v835_v38, %v835_v38  ;;  %v1784_v25 = vcombine.high %v1776_v53, %v1776_v53 }
  0x87   : > { %v1750_v19 = vrot.slane %v1722_v14, %v5295_v51  ;;  %v1752_v20 = vcombine.high %v1736_v15, %v1736_v15  ;;  %v2763_v36 = vcombine.low %v1753_v12, %v1736_v15  ;;  %v2232_v24 = vrot.slane %v2224_v46, %v5295_v51 }
  0x88   : > { %4823 = vmatmul.mubr.msk.f32.gmra.mrb[10].mxu0 %vm2339_vm1, %v2762_v17  ;;  %v2223_v23 = vrot.slane %v2195_v18, %v5295_v51  ;;  %v1792_v26 = vrot.slane %v1776_v53, %v5295_v51  ;;  %v1247_v29 = vrot.slane %v1233_v22, %v5295_v51  ;;  %v1806_v31 = vrot.slane %v1784_v25, %v5295_v51 }
  0x89   : > { %4825 = vmatprep.mubr.msk.f32.mxu0 %vm5054_vm0, %v5053_v35  ;;  %v1754_v54 = vcombine.high %v1750_v19, %v1750_v19  ;;  %v2764_v58 = vcombine.low %v1750_v19, %v1752_v20  ;;  %v2773_v27 = vrot.slane %v2763_v36, %v5295_v51  ;;  %v1295_v52 = vrot.slane %v4693_v21, %v5295_v51  ;;  %v4694_v36 = vld.sshfl [vmem:[%s5275_s24 + $0x78] sm:$0x1 pattern:$0x75316420] }
  0x8a   : > { %v2225_v30 = vcombine.low %v2216_v13, %v2223_v23  ;;  %v1303_v3 = vrot.slane %v837_v28, %v5295_v51  ;;  %v1249_v34 = vcombine.high %v1247_v29, %v1247_v29  ;;  %v1263_v37 = vrot.slane %v1247_v29, %v5295_v51 }
  0x8b   : > { %v2765_v32 = vcombine.low %v1754_v54, %v1768_v16  ;;  %v2780_v33 = vrot.slane %v2764_v58, %v5295_v51  ;;  %v2766_v39 = vcombine.low %v1792_v26, %v1806_v31  ;;  %v4709_v41 = vcombine.high %v1256_v4, %v1270_v57 }
  0x8c   : > { %v2239_v38 = vrot.slane %v2225_v30, %v5295_v51  ;;  %v1319_v40 = vrot.slane %v1303_v3, %v5295_v51  ;;  %v1277_v42 = vrot.slane %v1249_v34, %v5295_v51  ;;  %v1769_v44 = vcombine.high %v1371_v0, %v1371_v0 }
  0x8d   : > { %v2787_v49 = vrot.slane %v2765_v32, %v5295_v51  ;;  %v2795_v56 = vcombine.low %v2773_v27, %v2780_v33  ;;  %v2794_v47 = vrot.slane %v2766_v39, %v5295_v51  ;;  %v2251_v60 = vrot.slane %v4709_v41, %v5295_v51 }
  0x8e   : > { %v2240_v45 = vcombine.low %v2232_v24, %v2239_v38  ;;  %v2244_v48 = vcombine.low %v1295_v52, %v1319_v40  ;;  %v2242_v62 = vcombine.low %v1263_v37, %v1277_v42  ;;  %v4710_v63 = vcombine.high %v1263_v37, %v1277_v42 }
  0x8f   : > { %v2803_v61 = vrot.slane %v2795_v56, %v5295_v51  ;;  %v1783_v55 = vrot.slane %v1769_v44, %v5295_v51  ;;  %v2796_v59 = vcombine.low %v2787_v49, %v2794_v47  ;;  %v1831_v4 = vrot.slane %v4701_v43, %v5295_v51  ;;  %v4702_v44 = vld.sshfl [vmem:[%s5278_s21 + $0x78] sm:$0x1 pattern:$0x75316420] }
  0x90   : > { %4797 = vmatmul.mubr.msk.f32.gmra.mrb[12].mxu1 %vm2339_vm1, %v2240_v45  ;;  %v2272_v2 = vrot.slane %v2244_v48, %v5295_v51  ;;  %v1839_v5 = vrot.slane %v1373_v1, %v5295_v51  ;;  %v2258_v6 = vrot.slane %v2242_v62, %v5295_v51  ;;  %v2265_v7 = vrot.slane %v4710_v63, %v5295_v51 }
  0x91   : > { %4799 = vmatprep.mubr.msk.f32.mxu1 %vm5054_vm0, %v5053_v35  ;;  %v1785_v8 = vcombine.high %v1783_v55, %v1783_v55  ;;  %v1799_v10 = vrot.slane %v1783_v55, %v5295_v51  ;;  %v2810_v0 = vrot.slane %v2796_v59, %v5295_v51  ;;  %v4726_v9 = vcombine.high %v1792_v26, %v1806_v31 }
  0x92   : > { %v5606_v50 = vrot.slane %v1839_v5, %v5295_v51  ;;  %v1296_v57 = vcombine.high %v837_v28, %v837_v28  ;;  %v2273_v11 = vcombine.low %v2251_v60, %v2258_v6  ;;  %v2274_v12 = vcombine.low %v2265_v7, %v2272_v2 }
  0x93   : > { %v1813_v13 = vrot.slane %v1785_v8, %v5295_v51  ;;  %v1311_v14 = vcombine.high %v1303_v3, %v1303_v3  ;;  %v2811_v15 = vcombine.low %v2803_v61, %v2810_v0  ;;  %v2822_v17 = vrot.slane %v4726_v9, %v5295_v51 }
  0x94   : > { %v2815_v16 = vcombine.low %v1831_v4, %v5606_v50  ;;  %v1310_v18 = vrot.slane %v1296_v57, %v5295_v51  ;;  %v2281_v46 = vrot.slane %v2273_v11, %v5295_v51  ;;  %v2288_v53 = vrot.slane %v2274_v12, %v5295_v51 }
  0x95   : > { %v2813_v19 = vcombine.low %v1799_v10, %v1813_v13  ;;  %v4727_v20 = vcombine.high %v1799_v10, %v1813_v13  ;;  %4826 = vmatmul.mubr.msk.f32.gmra.mrb[12].mxu0 %vm2339_vm1, %v2811_v15  ;;  %v1333_v24 = vrot.slane %v1311_v14, %v5295_v51  ;;  %v1341_v58 = vcombine.high %v1319_v40, %v1319_v40  ;;  %v1895_v14 = vld [vmem:[%s791_s11] sm:$0xff] }
  0x96   : > { %v2843_v21 = vrot.slane %v2815_v16, %v5295_v51  ;;  %v1312_v22 = vcombine.high %v1310_v18, %v1310_v18  ;;  %v1326_v23 = vrot.slane %v1310_v18, %v5295_v51  ;;  %4828 = vmatprep.mubr.msk.f32.mxu0 %vm5054_vm0, %v5053_v35  ;;  %v2289_v25 = vcombine.low %v2281_v46, %v2288_v53  ;;  %v1896_v18 = vld [vmem:[%s791_s11 + $0x8] sm:$0x1] }
  0x97   : > { %v2829_v26 = vrot.slane %v2813_v19, %v5295_v51  ;;  %v2836_v54 = vrot.slane %v4727_v20, %v5295_v51  ;;  %v1343_v29 = vcombine.high %v1333_v24, %v1333_v24  ;;  %v1358_v30 = vrot.slane %v4694_v36, %v5295_v51 }
  0x98   : > { %v1340_v27 = vrot.slane %v1312_v22, %v5295_v51  ;;  %v1342_v28 = vcombine.high %v1326_v23, %v1326_v23  ;;  %4800 = vmatmul.mubr.msk.f32.gmra.mrb[14].mxu1 %vm2339_vm1, %v2289_v25  ;;  %v2290_v3 = vcombine.low %v1333_v24, %v1341_v58  ;;  %v1832_v32 = vcombine.high %v1373_v1, %v1373_v1 }
  0x99   : > { %v2844_v31 = vcombine.low %v2822_v17, %v2829_v26  ;;  %v2845_v52 = vcombine.low %v2836_v54, %v2843_v21  ;;  %4802 = vmatprep.mubr.msk.f32.mxu1 %vm5054_vm0, %v5053_v35  ;;  %v2291_v34 = vcombine.low %v1343_v29, %v1326_v23  ;;  %v1847_v38 = vcombine.high %v1839_v5, %v1839_v5 }
  0x9a   : > { %v1344_v33 = vcombine.high %v1340_v27, %v1340_v27  ;;  %v2292_v37 = vcombine.low %v1340_v27, %v1342_v28  ;;  %v2300_v41 = vrot.slane %v2290_v3, %v5295_v51  ;;  %v1846_v49 = vrot.slane %v1832_v32, %v5295_v51 }
  0x9b   : > { %v2852_v39 = vrot.slane %v2844_v31, %v5295_v51  ;;  %v2859_v40 = vrot.slane %v2845_v52, %v5295_v51  ;;  %v2307_v42 = vrot.slane %v2291_v34, %v5295_v51  ;;  %v1869_v45 = vrot.slane %v1847_v38, %v5295_v51 }
  0x9c   : > { %v2293_v56 = vcombine.low %v1344_v33, %v1358_v30  ;;  %v2314_v43 = vrot.slane %v2292_v37, %v5295_v51  ;;  %v1848_v48 = vcombine.high %v1846_v49, %v1846_v49  ;;  %v1862_v60 = vrot.slane %v1846_v49, %v5295_v51 }
  0x9d   : > { %v2860_v47 = vcombine.low %v2852_v39, %v2859_v40  ;;  %v1877_v61 = vcombine.high %v5606_v50, %v5606_v50  ;;  %v2322_v63 = vcombine.low %v2300_v41, %v2307_v42  ;;  %v1879_v1 = vcombine.high %v1869_v45, %v1869_v45 }
  0x9e   : > { %v2321_v62 = vrot.slane %v2293_v56, %v5295_v51  ;;  %v1876_v55 = vrot.slane %v1848_v48, %v5295_v51  ;;  %v1878_v59 = vcombine.high %v1862_v60, %v1862_v60  ;;  %v1894_v2 = vrot.slane %v4702_v44, %v5295_v51 }
  0x9f   : > { %4829 = vmatmul.mubr.msk.f32.gmra.mrb[14].mxu0 %vm2339_vm1, %v2860_v47  ;;  %v2861_v4 = vcombine.low %v1869_v45, %v1877_v61  ;;  %v2330_v6 = vrot.slane %v2322_v63, %v5295_v51  ;;  %v2862_v7 = vcombine.low %v1879_v1, %v1862_v60 }
  0xa0   : > { %4831 = vmatprep.mubr.msk.f32.mxu0 %vm5054_vm0, %v5053_v35  ;;  %v2323_v5 = vcombine.low %v2314_v43, %v2321_v62  ;;  %v1880_v8 = vcombine.high %v1876_v55, %v1876_v55  ;;  %v2863_v10 = vcombine.low %v1876_v55, %v1878_v59 }
  0xa1   : > { %v2871_v0 = vrot.slane %v2861_v4, %v5295_v51  ;;  %v2878_v9 = vrot.slane %v2862_v7, %v5295_v51 }
  0xa2   : > { %v2337_v50 = vrot.slane %v2323_v5, %v5295_v51  ;;  %v2864_v57 = vcombine.low %v1880_v8, %v1894_v2  ;;  %v2885_v11 = vrot.slane %v2863_v10, %v5295_v51 }
  0xa3   : > { %v2893_v13 = vcombine.low %v2871_v0, %v2878_v9 }
  0xa4   : > { %v2338_v12 = vcombine.low %v2330_v6, %v2337_v50  ;;  %v2892_v15 = vrot.slane %v2864_v57, %v5295_v51 }
  0xa5   : > { %v2901_v17 = vrot.slane %v2893_v13, %v5295_v51 }
  0xa6   : > { %4803 = vmatmul.mubr.msk.f32.gmra.mrb[16].mxu1 %vm2339_vm1, %v2338_v12  ;;  %v2894_v16 = vcombine.low %v2885_v11, %v2892_v15 }
  0xa7   : > { %4836 = vmatprep.mubr.msk.f32.mxu1 %vm2339_vm1, %v1895_v14 }
  0xa8   : > { %v2908_v46 = vrot.slane %v2894_v16, %v5295_v51 }
  0xaa   : > { %4837 = vmatmul.mubr.msk.f32.vlgmr.msra.gmra.mrb[18].mxu1 %vm2339_vm1, %v1896_v18  ;;  %v2909_v53 = vcombine.low %v2901_v17, %v2908_v46 }
  0xac   : > { %4832 = vmatmul.mubr.msk.f32.gmra.mrb[16].mxu0 %vm2339_vm1, %v2909_v53 }
 0x11e   : > { %v2424_v19 = vpop.f32.mrb[0].mxu1 }
 0x11f   : > { %v2994_v20 = vpop.f32.mrb[0].mxu0  ;;  %v4780_v36 = vpop.f32.mrb[1].mxu1 }
 0x120   : > { %v5661_v21 = vadd.f32 %v2994_v20, %v2424_v19  ;;  %v4809_v22 = vpop.f32.mrb[1].mxu0 }
 0x125   : > { %v5663_v23 = vpop.f32.mrb[2].mxu1 }
 0x126   : > { %v4783_v24 = vpop.f32.mrb[3].mxu1  ;;  %v3211_v27 = vrot.slane %v5663_v23, 1 }
 0x12d   : > { %v2999_v25 = vpop.f32.mrb[2].mxu0 }
 0x12e   : > { %v5666_v26 = vadd.f32 %v2999_v25, %v5663_v23  ;;  %v4812_v54 = vpop.f32.mrb[3].mxu0 }
 0x133   : > { %v5668_v58 = vpop.f32.mrb[4].mxu1 }
 0x134   : > { %v3212_v28 = vrot.slane %v5668_v58, 1  ;;  %v4786_v29 = vpop.f32.mrb[5].mxu1 }
 0x136   : > { %v5673_v30 = vsel %vm3138_vm2, %v3211_v27, %v3212_v28 }
 0x138   : > { %v3004_v31 = vpop.f32.mrb[4].mxu0 }
 0x139   : > { %v5676_v52 = vadd.f32 %v3004_v31, %v5668_v58  ;;  %v4815_v3 = vpop.f32.mrb[5].mxu0 }
 0x13f   : > { %v5678_v32 = vpop.f32.mrb[6].mxu1 }
 0x140   : > { %v3214_v33 = vrot.slane %v5678_v32, 1  ;;  %v4789_v34 = vpop.f32.mrb[7].mxu1 }
 0x142   : > { %v3215_v37 = vsel %vm3138_vm2, %v3212_v28, %v3214_v33  ;;  %v3142_v28 = vrot.slane %v5676_v52, 1 }
 0x143   : > { %3233 = vrot.lane.b32.xlu1 %v3215_v37, %s5056_s12 }
 0x144   : > { %v3009_v38 = vpop.f32.mrb[6].mxu0 }
 0x145   : > { %v5684_v39 = vadd.f32 %v3009_v38, %v5678_v32  ;;  %v4818_v40 = vpop.f32.mrb[7].mxu0 }
 0x14a   : > { %v5686_v41 = vpop.f32.mrb[8].mxu1 }
 0x14b   : > { %v3216_v49 = vrot.slane %v5686_v41, 1  ;;  %v4792_v56 = vpop.f32.mrb[9].mxu1 }
 0x14d   : > { %v3217_v42 = vsel %vm3138_vm2, %v3214_v33, %v3216_v49  ;;  %v3140_v33 = vrot.slane %v5666_v26, 1 }
 0x14e   : > { %3235 = vrot.lane.b32.xlu1 %v3217_v42, %s5056_s12 }
 0x14f   : > { %v3014_v43 = vpop.f32.mrb[8].mxu0 }
 0x150   : > { %v5692_v44 = vadd.f32 %v3014_v43, %v5686_v41  ;;  %v4821_v45 = vpop.f32.mrb[9].mxu0 }
 0x152   : > { %v3146_v40 = vrot.slane %v5692_v44, 1 }
 0x154   : > { %v2449_v47 = vpop.f32.mrb[10].mxu1 }
 0x155   : > { %v3218_v48 = vrot.slane %v2449_v47, 1  ;;  %v4795_v60 = vpop.f32.mrb[11].mxu1 }
 0x157   : > { %v3219_v61 = vsel %vm3138_vm2, %v3216_v49, %v3218_v48 }
 0x15b   : > { %v3019_v62 = vpop.f32.mrb[10].mxu0 }
 0x15c   : > { %v5695_v63 = vadd.f32 %v3019_v62, %v2449_v47  ;;  %v4824_v1 = vpop.f32.mrb[11].mxu0 }
 0x163   : > { %v2454_v55 = vpop.f32.mrb[12].mxu1 }
 0x164   : > { %v3220_v59 = vrot.slane %v2454_v55, 1  ;;  %v4798_v2 = vpop.f32.mrb[13].mxu1 }
 0x166   : > { %v3221_v4 = vsel %vm3138_vm2, %v3218_v48, %v3220_v59 }
 0x167   : > { %3239 = vrot.lane.b32.xlu1 %v3221_v4, %s5056_s12 }
 0x168   : > { %v3024_v5 = vpop.f32.mrb[12].mxu0 }
 0x169   : > { %v5699_v6 = vadd.f32 %v3024_v5, %v2454_v55  ;;  %v4827_v7 = vpop.f32.mrb[13].mxu0 }
 0x16b   : > { %v2459_v8 = vpop.f32.mrb[14].mxu1  ;;  %v3150_v49 = vrot.slane %v5699_v6, 1 }
 0x16c   : > { %v3222_v10 = vrot.slane %v2459_v8, 1  ;;  %v4801_v0 = vpop.f32.mrb[15].mxu1 }
 0x16e   : > { %v3223_v50 = vsel %vm3138_vm2, %v3220_v59, %v3222_v10 }
 0x172   : > { %v3029_v9 = vpop.f32.mrb[14].mxu0 }
 0x173   : > { %v5702_v57 = vadd.f32 %v3029_v9, %v2459_v8  ;;  %v4830_v11 = vpop.f32.mrb[15].mxu0 }
 0x179   : > { %v5704_v12 = vpop.f32.mrb[16].mxu1 }
 0x17a   : > { %v3224_v13 = vrot.slane %v5704_v12, 1  ;;  %v4804_v14 = vpop.f32.mrb[17].mxu1 }
 0x17c   : > { %v3225_v15 = vsel %vm3138_vm2, %v3222_v10, %v3224_v13 }
 0x17d   : > { %3243 = vrot.lane.b32.xlu1 %v3225_v15, %s5056_s12  ;;  %v4838_v16 = vpop.f32.mrb[18].mxu1 }
 0x17e   : > { %v3111_v17 = vpop.f32.mrb[19].mxu1 }
 0x17f   : > { %3197 = vrot.lane.b32.xlu0 %v3111_v17, %s5057_s30  ;;  %v3034_v18 = vpop.f32.mrb[16].mxu0 }
 0x180   : > { %v5710_v46 = vadd.f32 %v3034_v18, %v5704_v12  ;;  %v4833_v53 = vpop.f32.mrb[17].mxu0 }
 0x182   : > { %v3154_v1 = vrot.slane %v5710_v46, 1 }
 0x183   : > { %3199 = vrot.lane.b32.xlu0 %v4838_v16, %s5057_s30 }
 0x184   : > { %v3157_v11 = vsel %vm3138_vm2, %v3154_v1, 0.0 }
 0x187   : > { %3237 = vrot.lane.b32.xlu0 %v3219_v61, %s5056_s12 }
 0x18b   : > { %3241 = vrot.lane.b32.xlu0 %v3223_v50, %s5056_s12 }
 0x1b5   : > { %v3234_v19 = vpop.permute.xlu1 %3233 }
 0x1b6   : > { %v3262_v9 = vadd.f32 %v3234_v19, %v5668_v58 }
 0x1b8   : > { %v3282_v14 = vrot.slane %v3262_v9, 1 }
 0x1c0   : > { %v3236_v20 = vpop.permute.xlu1 %3235 }
 0x1c1   : > { %v3263_v29 = vadd.f32 %v3236_v20, %v5678_v32  ;;  %v3143_v32 = vsel %vm3138_vm2, %v3140_v33, %v3142_v28 }
 0x1c3   : > { %v3284_v56 = vrot.slane %v3263_v29, 1 }
 0x1c5   : > { %v3285_v15 = vsel %vm3138_vm2, %v3282_v14, %v3284_v56 }
 0x1d9   : > { %v3240_v25 = vpop.permute.xlu1 %3239 }
 0x1da   : > { %v3265_v31 = vadd.f32 %v3240_v25, %v2449_v47  ;;  %v3144_v47 = vrot.slane %v5684_v39, 1 }
 0x1dc   : > { %v3288_v42 = vrot.slane %v3265_v31, 1  ;;  %v3147_v62 = vsel %vm3138_vm2, %v3144_v47, %v3146_v40  ;;  %v3145_v50 = vsel %vm3138_vm2, %v3142_v28, %v3144_v47 }
 0x1ef   : > { %v3244_v34 = vpop.permute.xlu1 %3243 }
 0x1f0   : > { %v3267_v43 = vadd.f32 %v3244_v34, %v2459_v8 }
 0x1f1   : > { %v5714_v36 = vpop.permute.xlu0 %3197 }
 0x1f2   : > { %v3226_v22 = vrot.slane %v5714_v36, 1  ;;  %v3292_v59 = vrot.slane %v3267_v43, 1 }
 0x1f4   : > { %v3227_v24 = vsel %vm3138_vm2, %v3224_v13, %v3226_v22 }
 0x1f5   : > { %3245 = vrot.lane.b32.xlu0 %v3227_v24, %s5056_s12  ;;  %v5719_v54 = vpop.permute.xlu0 %3199 }
 0x1f6   : > { %v3228_v27 = vrot.slane %v5719_v54, 1 }
 0x1f8   : > { %v3229_v3 = vsel %vm3138_vm2, %v3226_v22, %v3228_v27 }
 0x1f9   : > { %3231 = vrot.lane.b32.xlu0 %v5673_v30, %s5056_s12  ;;  %3247 = vrot.lane.b32.xlu1 %v3229_v3, %s5056_s12  ;;  %v3238_v37 = vpop.permute.xlu0 %3237 }
 0x1fa   : > { %v3264_v38 = vadd.f32 %v3238_v37, %v5686_v41  ;;  %v3148_v41 = vrot.slane %v5695_v63, 1 }
 0x1fc   : > { %v3286_v45 = vrot.slane %v3264_v38, 1  ;;  %v3151_v4 = vsel %vm3138_vm2, %v3148_v41, %v3150_v49  ;;  %v3149_v0 = vsel %vm3138_vm2, %v3146_v40, %v3148_v41 }
 0x1fd   : > { %3161 = vrot.lane.b32.xlu0 %v3143_v32, %s5056_s12  ;;  %3249 = vrot.lane.b32.xlu1 %v5053_v35, %s5056_s12  ;;  %v3242_v30 = vpop.permute.xlu0 %3241  ;;  %v3139_v35 = vrot.slane %v5661_v21, 1 }
 0x1fe   : > { %v3266_v48 = vadd.f32 %v3242_v30, %v2454_v55  ;;  %v3289_v60 = vsel %vm3138_vm2, %v3286_v45, %v3288_v42  ;;  %v3287_v61 = vsel %vm3138_vm2, %v3284_v56, %v3286_v45  ;;  %v3152_v55 = vrot.slane %v5702_v57, 1 }
 0x1ff   : > { %v3141_v8 = vsel %vm3138_vm2, %v3139_v35, %v3140_v33 }
 0x200   : > { %v3290_v2 = vrot.slane %v3266_v48, 1  ;;  %v3155_v10 = vsel %vm3138_vm2, %v3152_v55, %v3154_v1  ;;  %v3153_v13 = vsel %vm3138_vm2, %v3150_v49, %v3152_v55 }
 0x201   : > { %3169 = vrot.lane.b32.xlu0 %v3151_v4, %s5056_s12  ;;  %3165 = vrot.lane.b32.xlu1 %v3147_v62, %s5056_s12 }
 0x202   : > { %v3291_v5 = vsel %vm3138_vm2, %v3288_v42, %v3290_v2  ;;  %v3293_v7 = vsel %vm3138_vm2, %v3290_v2, %v3292_v59  ;;  %v5797_v42 = vld [vmem:[%s6029_s6] ss:$0 sm:$0xff] }
 0x205   : > { %3159 = vrot.lane.b32.xlu0 %v3141_v8, %s5056_s12  ;;  %3173 = vrot.lane.b32.xlu1 %v3155_v10, %s5056_s12 }
 0x209   : > { %3167 = vrot.lane.b32.xlu0 %v3149_v0, %s5056_s12  ;;  %3163 = vrot.lane.b32.xlu1 %v3145_v50, %s5056_s12 }
 0x20d   : > { %3175 = vrot.lane.b32.xlu0 %v3157_v11, %s5056_s12  ;;  %3171 = vrot.lane.b32.xlu1 %v3153_v13, %s5056_s12 }
 0x211   : > { %3302 = vrot.lane.b32.xlu1 %v3285_v15, %s5058_s13  ;;  %3306 = vrot.lane.b32.xlu0 %v3289_v60, %s5058_s13 }
 0x215   : > { %3304 = vrot.lane.b32.xlu0 %v3287_v61, %s5058_s13 }
 0x267   : > { %v3246_v16 = vpop.permute.xlu0 %3245 }
 0x268   : > { %v3268_v58 = vadd.f32 %v3246_v16, %v5704_v12 }
 0x26a   : > { %v3294_v17 = vrot.slane %v3268_v58, 1 }
 0x26b   : > { %v3248_v18 = vpop.permute.xlu1 %3247  ;;  %v3232_v53 = vpop.permute.xlu0 %3231 }
 0x26c   : > { %v3269_v19 = vadd.f32 %v3248_v18, %v5714_v36  ;;  %v3261_v20 = vadd.f32 %v3232_v53, %v5663_v23  ;;  %v3295_v22 = vsel %vm3138_vm2, %v3292_v59, %v3294_v17 }
 0x26e   : > { %v3296_v24 = vrot.slane %v3269_v19, 1  ;;  %v3281_v25 = vrot.slane %v3261_v20, 1 }
 0x26f   : > { %v3250_v27 = vpop.permute.xlu1 %3249  ;;  %v3162_v28 = vpop.permute.xlu0 %3161 }
 0x270   : > { %v3297_v29 = vsel %vm3138_vm2, %v3294_v17, %v3296_v24  ;;  %v3283_v31 = vsel %vm3138_vm2, %v3281_v25, %v3282_v14  ;;  %v3270_v36 = vadd.f32 %v3250_v27, %v5719_v54  ;;  %v3187_v32 = vadd.f32 %v3162_v28, %v5666_v26 }
 0x271   : > { %3314 = vrot.lane.b32.xlu0 %v3297_v29, %s5058_s13  ;;  %3300 = vrot.lane.b32.xlu1 %v3283_v31, %s5058_s13 }
 0x272   : > { %v3298_v34 = vrot.slane %v3270_v36, 1 }
 0x273   : > { %v3166_v12 = vpop.permute.xlu1 %3165  ;;  %v5774_v3 = vpop.permute.xlu0 %3169 }
 0x274   : > { %v3299_v40 = vsel %vm3138_vm2, %v3296_v24, %v3298_v34  ;;  %v3189_v56 = vadd.f32 %v3166_v12, %v5684_v39 }
 0x275   : > { %3312 = vrot.lane.b32.xlu0 %v3295_v22, %s5058_s13  ;;  %3308 = vrot.lane.b32.xlu1 %v3291_v5, %s5058_s13 }
 0x277   : > { %v5779_v23 = vpop.permute.xlu1 %3173  ;;  %v5781_v33 = vpop.permute.xlu0 %3159 }
 0x279   : > { %3310 = vrot.lane.b32.xlu1 %v3293_v7, %s5058_s13 }
 0x27b   : > { %v3164_v37 = vpop.permute.xlu1 %3163  ;;  %v5784_v38 = vpop.permute.xlu0 %3167 }
 0x27c   : > { %v3188_v60 = vadd.f32 %v3164_v37, %v5676_v52 }
 0x27d   : > { %3316 = vrot.lane.b32.xlu1 %v3299_v40, %s5058_s13 }
 0x27f   : > { %v5788_v49 = vpop.permute.xlu1 %3171  ;;  %v5790_v54 = vpop.permute.xlu0 %3175 }
 0x283   : > { %v3303_v43 = vpop.permute.xlu1 %3302  ;;  %v3307_v45 = vpop.permute.xlu0 %3306 }
 0x284   : > { %v3328_v47 = vadd.f32 %v3303_v43, %v3187_v32  ;;  %v3330_v30 = vadd.f32 %v3307_v45, %v3189_v56 }
 0x286   : > { %v3344_v41 = vadd.f32 %v5797_v42, %v3328_v47  ;;  %v3346_v48 = vadd.f32 %v5797_v42, %v3330_v30 }
 0x287   : > { %v3305_v61 = vpop.permute.xlu0 %3304 }
 0x288   : > { %v3410_v26 = vcombine.high %v3344_v41, %v3344_v41  ;;  %v3417_v39 = vrot.slane %v3344_v41, %v5295_v51  ;;  %v3508_v62 = vcombine.high %v3346_v48, %v3346_v48  ;;  %v3515_v1 = vrot.slane %v3346_v48, %v5295_v51 }
 0x289   : > { %v3329_v59 = vadd.f32 %v3305_v61, %v3188_v60 }
 0x28a   : > { %v3424_v2 = vrot.slane %v3410_v26, %v5295_v51  ;;  %v3425_v4 = vcombine.high %v3417_v39, %v3417_v39  ;;  %v3433_v35 = vrot.slane %v3417_v39, %v5295_v51  ;;  %v3522_v55 = vrot.slane %v3508_v62, %v5295_v51 }
 0x28b   : > { %v3523_v5 = vcombine.high %v3515_v1, %v3515_v1  ;;  %v3531_v7 = vrot.slane %v3515_v1, %v5295_v51  ;;  %v3345_v16 = vadd.f32 %v5797_v42, %v3329_v59 }
 0x28c   : > { %v3426_v52 = vcombine.high %v3424_v2, %v3424_v2  ;;  %v3440_v8 = vrot.slane %v3424_v2, %v5295_v51  ;;  %v3447_v10 = vrot.slane %v3425_v4, %v5295_v51  ;;  %v3857_v0 = vrot.slane %v3433_v35, %v5295_v51 }
 0x28d   : > { %v3524_v50 = vcombine.high %v3522_v55, %v3522_v55  ;;  %v3538_v9 = vrot.slane %v3522_v55, %v5295_v51  ;;  %v3545_v11 = vrot.slane %v3523_v5, %v5295_v51  ;;  %v3455_v14 = vcombine.high %v3433_v35, %v3433_v35 }
 0x28e   : > { %v3454_v13 = vrot.slane %v3426_v52, %v5295_v51  ;;  %v3457_v15 = vcombine.high %v3447_v10, %v3447_v10  ;;  %v3864_v58 = vrot.slane %v3857_v0, %v5295_v51  ;;  %v3553_v18 = vcombine.high %v3531_v7, %v3531_v7 }
 0x28f   : > { %v5823_v17 = vrot.slane %v3524_v50, %v5295_v51  ;;  %v3554_v53 = vcombine.high %v3538_v9, %v3538_v9  ;;  %v3456_v19 = vcombine.high %v3440_v8, %v3440_v8  ;;  %v3555_v20 = vcombine.high %v3545_v11, %v3545_v11 }
 0x290   : > { %v3866_v22 = vcombine.low %v3457_v15, %v3440_v8  ;;  %4325 = vst.msk [vmem:[%s5817_s26 + $0x8] sm:$0x1] %vm4324_vm3, %v3864_v58  ;;  %v3983_v24 = vrot.slane %v3553_v18, %v5295_v51  ;;  %v3865_v27 = vcombine.low %v3447_v10, %v3455_v14  ;;  %v3459_v29 = vcombine.high %v3345_v16, %v3345_v16 }
 0x291   : > { %v3992_v25 = vcombine.low %v5823_v17, %v3554_v53  ;;  %v3991_v28 = vcombine.low %v3555_v20, %v3538_v9  ;;  %v3458_v36 = vcombine.high %v3454_v13, %v3454_v13  ;;  %v3466_v34 = vrot.slane %v3345_v16, %v5295_v51 }
 0x292   : > { %v3990_v31 = vrot.slane %v3983_v24, %v5295_v51  ;;  %v3867_v37 = vcombine.low %v3454_v13, %v3456_v19  ;;  %v3473_v32 = vrot.slane %v3459_v29, %v5295_v51  ;;  %v3882_v56 = vrot.slane %v3866_v22, %v5295_v51 }
 0x293   : > { %v4008_v12 = vrot.slane %v3992_v25, %v5295_v51  ;;  %v4001_v40 = vrot.slane %v3991_v28, %v5295_v51  ;;  %v3474_v43 = vcombine.high %v3466_v34, %v3466_v34  ;;  %v3482_v45 = vrot.slane %v3466_v34, %v5295_v51 }
 0x294   : > { %4329 = vst.msk [vmem:[%s5817_s26 + $0x28] sm:$0x1] %vm4324_vm3, %v3990_v31  ;;  %v3475_v30 = vcombine.high %v3473_v32, %v3473_v32  ;;  %v3875_v41 = vrot.slane %v3865_v27, %v5295_v51  ;;  %v3931_v61 = vcombine.low %v3531_v7, %v3545_v11  ;;  %v3889_v26 = vrot.slane %v3867_v37, %v5295_v51 }
 0x295   : > { %v5838_v47 = vcombine.low %v4001_v40, %v4008_v12  ;;  %v3496_v48 = vrot.slane %v3474_v43, %v5295_v51  ;;  %v3868_v60 = vcombine.low %v3458_v36, %v3482_v45  ;;  %v3489_v39 = vrot.slane %v3473_v32, %v5295_v51 }
 0x296   : > { %v3503_v62 = vrot.slane %v3475_v30, %v5295_v51  ;;  %v3897_v1 = vcombine.low %v3875_v41, %v3882_v56  ;;  %v3959_v7 = vrot.slane %v3931_v61, %v5295_v51  ;;  %v3193_v18 = vadd.f32 %v5779_v23, %v5702_v57 }
 0x297   : > { %v3896_v59 = vrot.slane %v3868_v60, %v5295_v51  ;;  %v3920_v2 = vrot.slane %v3496_v48, %v5295_v51  ;;  %v4742_v4 = vcombine.high %v3482_v45, %v3496_v48  ;;  %v3186_v53 = vadd.f32 %v5781_v33, %v5661_v21 }
 0x298   : > { %v3929_v35 = vcombine.low %v3489_v39, %v3503_v62  ;;  %v4743_v55 = vcombine.high %v3489_v39, %v3503_v62  ;;  %v3905_v50 = vrot.slane %v3897_v1, %v5295_v51  ;;  %v3190_v28 = vadd.f32 %v5784_v38, %v5692_v44 }
 0x299   : > { %v3898_v5 = vcombine.low %v3889_v26, %v3896_v59  ;;  %v3927_v52 = vrot.slane %v3920_v2, %v5295_v51  ;;  %v3938_v8 = vrot.slane %v4742_v4, %v5295_v51  ;;  %v5874_v21 = vadd.f32 %v5774_v3, %v5695_v63 }
 0x29a   : > { %v3945_v10 = vrot.slane %v3929_v35, %v5295_v51  ;;  %v3952_v0 = vrot.slane %v4743_v55, %v5295_v51  ;;  %v3192_v33 = vadd.f32 %v5788_v49, %v5699_v6  ;;  %v5880_v34 = vadd.f32 %v5790_v54, %v5710_v46 }
 0x29b   : > { %v3912_v9 = vrot.slane %v3898_v5, %v5295_v51  ;;  %4327 = vst.msk [vmem:[%s5817_s26 + $0x18] sm:$0x1] %vm4324_vm3, %v3927_v52  ;;  %v3556_v32 = vcombine.high %v5823_v17, %v5823_v17  ;;  %v4031_v39 = vrot.slane %v5838_v47, %v5295_v51 }
 0x29c   : > { %v3960_v11 = vcombine.low %v3938_v8, %v3945_v10  ;;  %v3961_v13 = vcombine.low %v3952_v0, %v3959_v7 }
 0x29d   : > { %v3913_v14 = vcombine.low %v3905_v50, %v3912_v9 }
 0x29e   : > { %v3968_v15 = vrot.slane %v3960_v11, %v5295_v51  ;;  %v3975_v16 = vrot.slane %v3961_v13, %v5295_v51 }
 0x29f   : > { %4326 = vst.msk [vmem:[%s5817_s26 + $0x10] sm:$0xff] %vm4322_vm4, %v3913_v14 }
 0x2a0   : > { %v3976_v58 = vcombine.low %v3968_v15, %v3975_v16 }
 0x2a2   : > { %4328 = vst.msk [vmem:[%s5817_s26 + $0x20] sm:$0xff] %vm4322_vm4, %v3976_v58 }
 0x2e3   : > { %v3301_v19 = vpop.permute.xlu1 %3300  ;;  %v3315_v20 = vpop.permute.xlu0 %3314 }
 0x2e4   : > { %v3327_v22 = vadd.f32 %v3301_v19, %v3186_v53  ;;  %v3334_v24 = vadd.f32 %v3315_v20, %v3193_v18 }
 0x2e6   : > { %v3343_v25 = vadd.f32 %v5797_v42, %v3327_v22  ;;  %v3350_v27 = vadd.f32 %v5797_v42, %v3334_v24 }
 0x2e7   : > { %v3309_v29 = vpop.permute.xlu1 %3308  ;;  %v3313_v23 = vpop.permute.xlu0 %3312 }
 0x2e8   : > { %v3361_v31 = vcombine.high %v3343_v25, %v3343_v25  ;;  %v3368_v12 = vrot.slane %v3343_v25, %v5295_v51  ;;  %v3704_v36 = vcombine.high %v3350_v27, %v3350_v27  ;;  %v3711_v57 = vrot.slane %v3350_v27, %v5295_v51 }
 0x2e9   : > { %v3331_v44 = vadd.f32 %v3309_v29, %v3190_v28  ;;  %v3333_v43 = vadd.f32 %v3313_v23, %v3192_v33 }
 0x2ea   : > { %v3375_v38 = vrot.slane %v3361_v31, %v5295_v51  ;;  %v3376_v37 = vcombine.high %v3368_v12, %v3368_v12  ;;  %v3718_v40 = vrot.slane %v3704_v36, %v5295_v51  ;;  %v3384_v56 = vrot.slane %v3368_v12, %v5295_v51 }
 0x2eb   : > { %v3719_v63 = vcombine.high %v3711_v57, %v3711_v57  ;;  %v3347_v3 = vadd.f32 %v5797_v42, %v3331_v44  ;;  %v3727_v62 = vrot.slane %v3711_v57, %v5295_v51  ;;  %v3349_v8 = vadd.f32 %v5797_v42, %v3333_v43  ;;  %v3311_v16 = vpop.permute.xlu1 %3310 }
 0x2ec   : > { %v3377_v6 = vcombine.high %v3375_v38, %v3375_v38  ;;  %v3391_v49 = vrot.slane %v3375_v38, %v5295_v51  ;;  %v3398_v46 = vrot.slane %v3376_v37, %v5295_v51  ;;  %v3720_v54 = vcombine.high %v3718_v40, %v3718_v40 }
 0x2ed   : > { %v3734_v45 = vrot.slane %v3718_v40, %v5295_v51  ;;  %v5892_v30 = vrot.slane %v3719_v63, %v5295_v51  ;;  %v3557_v41 = vcombine.high %v3347_v3, %v3347_v3  ;;  %v3564_v17 = vrot.slane %v3347_v3, %v5295_v51 }
 0x2ee   : > { %v3405_v48 = vrot.slane %v3377_v6, %v5295_v51  ;;  %v3802_v60 = vcombine.low %v3384_v56, %v3398_v46  ;;  %v4740_v61 = vcombine.high %v3384_v56, %v3398_v46  ;;  %v5897_v26 = vrot.slane %v3720_v54, %v5295_v51 }
 0x2ef   : > { %v3750_v1 = vcombine.high %v3734_v45, %v3734_v45  ;;  %v3571_v59 = vrot.slane %v3557_v41, %v5295_v51  ;;  %v4181_v5 = vcombine.low %v3727_v62, %v5892_v30  ;;  %v3572_v9 = vcombine.high %v3564_v17, %v3564_v17  ;;  %v3317_v3 = vpop.permute.xlu1 %3316 }
 0x2f0   : > { %v3804_v2 = vcombine.low %v3391_v49, %v3405_v48  ;;  %v4741_v4 = vcombine.high %v3391_v49, %v3405_v48  ;;  %v3812_v35 = vrot.slane %v3802_v60, %v5295_v51  ;;  %v3819_v55 = vrot.slane %v4740_v61, %v5295_v51 }
 0x2f1   : > { %v4183_v52 = vcombine.low %v3734_v45, %v5897_v26  ;;  %v4235_v7 = vrot.slane %v3750_v1, %v5295_v51  ;;  %v4747_v11 = vcombine.high %v3727_v62, %v5892_v30  ;;  %v3573_v14 = vcombine.high %v3571_v59, %v3571_v59 }
 0x2f2   : > { %v3826_v10 = vrot.slane %v3804_v2, %v5295_v51  ;;  %v3833_v0 = vrot.slane %v4741_v4, %v5295_v51  ;;  %v3834_v50 = vcombine.low %v3812_v35, %v3819_v55  ;;  %v3580_v15 = vrot.slane %v3564_v17, %v5295_v51 }
 0x2f3   : > { %v4242_v13 = vrot.slane %v4235_v7, %v5295_v51  ;;  %v4211_v53 = vrot.slane %v4183_v52, %v5295_v51  ;;  %v3594_v19 = vrot.slane %v3572_v9, %v5295_v51  ;;  %v3587_v20 = vrot.slane %v3571_v59, %v5295_v51 }
 0x2f4   : > { %v3835_v58 = vcombine.low %v3826_v10, %v3833_v0  ;;  %v3842_v18 = vrot.slane %v3834_v50, %v5295_v51  ;;  %v3601_v22 = vrot.slane %v3573_v14, %v5295_v51  ;;  %v3602_v24 = vcombine.high %v3580_v15, %v3580_v15 }
 0x2f5   : > { %4337 = vst.msk [vmem:[%s5817_s26 + $0x68] sm:$0x1] %vm4324_vm3, %v4242_v13  ;;  %v3993_v25 = vcombine.low %v3556_v32, %v3580_v15  ;;  %v3604_v28 = vcombine.high %v3594_v19, %v3594_v19  ;;  %v3655_v29 = vcombine.high %v3349_v8, %v3349_v8  ;;  %v3662_v31 = vrot.slane %v3349_v8, %v5295_v51 }
 0x2f6   : > { %v3849_v27 = vrot.slane %v3835_v58, %v5295_v51  ;;  %v4204_v12 = vrot.slane %v4747_v11, %v5295_v51  ;;  %v3994_v36 = vcombine.low %v3594_v19, %v3602_v24  ;;  %v4054_v23 = vcombine.low %v3587_v20, %v3601_v22 }
 0x2f7   : > { %v4015_v57 = vrot.slane %v3993_v25, %v5295_v51  ;;  %v4046_v44 = vrot.slane %v3604_v28, %v5295_v51  ;;  %v4744_v38 = vcombine.high %v3587_v20, %v3601_v22  ;;  %v3669_v37 = vrot.slane %v3655_v29, %v5295_v51 }
 0x2f8   : > { %v3850_v33 = vcombine.low %v3842_v18, %v3849_v27  ;;  %v4022_v40 = vrot.slane %v3994_v36, %v5295_v51  ;;  %v4064_v32 = vrot.slane %v4054_v23, %v5295_v51  ;;  %v3670_v56 = vcombine.high %v3662_v31, %v3662_v31 }
 0x2f9   : > { %v5930_v63 = vrot.slane %v3662_v31, %v5295_v51  ;;  %v4213_v43 = vcombine.low %v4204_v12, %v4211_v53  ;;  %v4053_v6 = vrot.slane %v4046_v44, %v5295_v51  ;;  %v4071_v49 = vrot.slane %v4744_v38, %v5295_v51 }
 0x2fa   : > { %4323 = vst.msk [vmem:[%s5817_s26] sm:$0xff] %vm4322_vm4, %v3850_v33  ;;  %v3671_v46 = vcombine.high %v3669_v37, %v3669_v37  ;;  %v4024_v54 = vcombine.low %v4015_v57, %v4022_v40  ;;  %v3692_v45 = vrot.slane %v3670_v56, %v5295_v51  ;;  %v3332_v41 = vadd.f32 %v3311_v16, %v5874_v21 }
 0x2fb   : > { %v3700_v30 = vcombine.high %v5930_v63, %v5930_v63  ;;  %v4197_v17 = vrot.slane %v4181_v5, %v5295_v51  ;;  %4331 = vst.msk [vmem:[%s5817_s26 + $0x38] sm:$0x1] %vm4324_vm3, %v4053_v6  ;;  %v3685_v48 = vrot.slane %v3669_v37, %v5295_v51  ;;  %v3335_v61 = vadd.f32 %v3317_v3, %v5880_v34 }
 0x2fc   : > { %v3699_v60 = vrot.slane %v3671_v46, %v5295_v51  ;;  %v4038_v62 = vrot.slane %v4024_v54, %v5295_v51  ;;  %v4086_v1 = vcombine.low %v4064_v32, %v4071_v49  ;;  %v3702_v59 = vcombine.high %v3692_v45, %v3692_v45 }
 0x2fd   : > { %v3348_v2 = vadd.f32 %v5797_v42, %v3332_v41  ;;  %v4119_v4 = vcombine.low %v3692_v45, %v3700_v30  ;;  %v3351_v55 = vadd.f32 %v5797_v42, %v3335_v61  ;;  %v4227_v5 = vrot.slane %v4213_v43, %v5295_v51 }
 0x2fe   : > { %v4172_v21 = vrot.slane %v3699_v60, %v5295_v51  ;;  %v4746_v35 = vcombine.high %v3685_v48, %v3699_v60  ;;  %v4039_v34 = vcombine.low %v4031_v39, %v4038_v62  ;;  %v3752_v7 = vcombine.high %v5897_v26, %v5897_v26 }
 0x2ff   : > { %v3606_v52 = vcombine.high %v3348_v2, %v3348_v2  ;;  %v3613_v0 = vrot.slane %v3348_v2, %v5295_v51  ;;  %v3753_v50 = vcombine.high %v3351_v55, %v3351_v55  ;;  %v4094_v42 = vrot.slane %v4086_v1, %v5295_v51 }
 0x300   : > { %v4179_v8 = vrot.slane %v4172_v21, %v5295_v51  ;;  %v4190_v10 = vrot.slane %v4746_v35, %v5295_v51  ;;  %4330 = vst.msk [vmem:[%s5817_s26 + $0x30] sm:$0xff] %vm4322_vm4, %v4039_v34  ;;  %v4120_v9 = vcombine.low %v3702_v59, %v3685_v48  ;;  %v3760_v47 = vrot.slane %v3351_v55, %v5295_v51 }
 0x301   : > { %v3620_v11 = vrot.slane %v3606_v52, %v5295_v51  ;;  %v4141_v39 = vrot.slane %v4119_v4, %v5295_v51  ;;  %v3621_v26 = vcombine.high %v3613_v0, %v3613_v0  ;;  %v3767_v14 = vrot.slane %v3753_v50, %v5295_v51 }
 0x302   : > { %v4212_v13 = vcombine.low %v4190_v10, %v4197_v17  ;;  %4335 = vst.msk [vmem:[%s5817_s26 + $0x58] sm:$0x1] %vm4324_vm3, %v4179_v8  ;;  %v3629_v16 = vrot.slane %v3613_v0, %v5295_v51  ;;  %v3768_v18 = vcombine.high %v3760_v47, %v3760_v47  ;;  %v3776_v22 = vrot.slane %v3760_v47, %v5295_v51 }
 0x303   : > { %v3622_v15 = vcombine.high %v3620_v11, %v3620_v11  ;;  %v3636_v58 = vrot.slane %v3620_v11, %v5295_v51  ;;  %v3643_v19 = vrot.slane %v3621_v26, %v5295_v51  ;;  %v3769_v20 = vcombine.high %v3767_v14, %v3767_v14 }
 0x304   : > { %v4220_v53 = vrot.slane %v4212_v13, %v5295_v51  ;;  %v4148_v24 = vrot.slane %v4120_v9, %v5295_v51  ;;  %v3783_v36 = vrot.slane %v3767_v14, %v5295_v51  ;;  %v3790_v44 = vrot.slane %v3768_v18, %v5295_v51 }
 0x305   : > { %v3650_v25 = vrot.slane %v3622_v15, %v5295_v51  ;;  %v3652_v27 = vcombine.high %v3636_v58, %v3636_v58  ;;  %v4109_v28 = vrot.slane %v3636_v58, %v5295_v51  ;;  %v4056_v31 = vcombine.low %v3629_v16, %v3643_v19 }
 0x306   : > { %v4228_v29 = vcombine.low %v4220_v53, %v4227_v5  ;;  %v4745_v12 = vcombine.high %v3629_v16, %v3643_v19  ;;  %v3797_v40 = vrot.slane %v3769_v20, %v5295_v51  ;;  %v3798_v32 = vcombine.high %v3776_v22, %v3776_v22 }
 0x307   : > { %v3654_v57 = vcombine.high %v3650_v25, %v3650_v25  ;;  %v4116_v23 = vrot.slane %v4109_v28, %v5295_v51  ;;  %v4117_v33 = vcombine.low %v3650_v25, %v3652_v27  ;;  %v4078_v38 = vrot.slane %v4056_v31, %v5295_v51 }
 0x308   : > { %4336 = vst.msk [vmem:[%s5817_s26 + $0x60] sm:$0xff] %vm4322_vm4, %v4228_v29  ;;  %v4085_v37 = vrot.slane %v4745_v12, %v5295_v51  ;;  %v4150_v56 = vcombine.low %v4141_v39, %v4148_v24  ;;  %v3799_v43 = vcombine.high %v3783_v36, %v3783_v36  ;;  %v3800_v6 = vcombine.high %v3790_v44, %v3790_v44 }
 0x309   : > { %v4118_v3 = vcombine.low %v3654_v57, %v5930_v63  ;;  %4333 = vst.msk [vmem:[%s5817_s26 + $0x48] sm:$0x1] %vm4324_vm3, %v4116_v23  ;;  %v3801_v46 = vcombine.high %v3797_v40, %v3797_v40  ;;  %v4243_v54 = vcombine.low %v3752_v7, %v3776_v22  ;;  %v4244_v45 = vcombine.low %v3790_v44, %v3798_v32 }
 0x30a   : > { %v4087_v49 = vcombine.low %v4078_v38, %v4085_v37  ;;  %v4127_v30 = vrot.slane %v4117_v33, %v5295_v51  ;;  %v4245_v17 = vcombine.low %v3800_v6, %v3783_v36  ;;  %v4246_v48 = vcombine.low %v3797_v40, %v3799_v43 }
 0x30b   : > { %v4134_v41 = vrot.slane %v4118_v3, %v5295_v51  ;;  %v4253_v63 = vrot.slane %v4243_v54, %v5295_v51  ;;  %v4260_v61 = vrot.slane %v4244_v45, %v5295_v51  ;;  %v4298_v62 = vrot.slane %v3801_v46, %v5295_v51 }
 0x30c   : > { %v4101_v60 = vrot.slane %v4087_v49, %v5295_v51  ;;  %v4267_v59 = vrot.slane %v4245_v17, %v5295_v51  ;;  %v4274_v2 = vrot.slane %v4246_v48, %v5295_v51  ;;  %v4164_v55 = vrot.slane %v4150_v56, %v5295_v51 }
 0x30d   : > { %v4149_v1 = vcombine.low %v4127_v30, %v4134_v41  ;;  %v4275_v21 = vcombine.low %v4253_v63, %v4260_v61  ;;  %v4305_v35 = vrot.slane %v4298_v62, %v5295_v51 }
 0x30e   : > { %v4102_v4 = vcombine.low %v4094_v42, %v4101_v60  ;;  %v4276_v34 = vcombine.low %v4267_v59, %v4274_v2 }
 0x30f   : > { %v4157_v5 = vrot.slane %v4149_v1, %v5295_v51  ;;  %4339 = vst.msk [vmem:[%s5817_s26 + $0x78] sm:$0x1] %vm4324_vm3, %v4305_v35  ;;  %v4283_v7 = vrot.slane %v4275_v21, %v5295_v51 }
 0x310   : > { %4332 = vst.msk [vmem:[%s5817_s26 + $0x40] sm:$0xff] %vm4322_vm4, %v4102_v4  ;;  %v4290_v8 = vrot.slane %v4276_v34, %v5295_v51 }
 0x311   : > { %v4165_v52 = vcombine.low %v4157_v5, %v4164_v55 }
 0x312   : > { %v4291_v10 = vcombine.low %v4283_v7, %v4290_v8 }
 0x313   : > { %4334 = vst.msk [vmem:[%s5817_s26 + $0x50] sm:$0xff] %vm4322_vm4, %v4165_v52 }
 0x314   : > { %4338 = vst.msk [vmem:[%s5817_s26 + $0x70] sm:$0xff] %vm4322_vm4, %v4291_v10 }
 0x315 PF: > { %s17_s28 = sadd.s32 1, %s5039_s28   ;;  %s6034_s24 = smov %s5027_s25 }
 0x316   : > { %p14_p12 = scmp.ge.s32.totalorder %s17_s28, 4   ;;  %s6035_s25 = smov %s5138_s10 }
 0x317   : > { %s6036_s26 = smov %s5035_s27  ;;  %s6037_s27 = smov %s6039_s29 }
 0x318   :  { %16 = sbr.rel (!%p14_p12) target bundleno = 3 (0x3), region = 270 }

</bundles_post_ra>
